<compile_context>
chip_gen: v7x
topology: tpu7x:2x2x1
jax: 0.10.0
libtpu: 0.0.40
codegen_flags: <defaults>
</compile_context>

<pallas_src>
import functools

import jax
import jax.numpy as jnp
from jax.experimental import pallas as pl
from jax.experimental.pallas import tpu as pltpu


def _round_up(x, m):
    return ((x + m - 1) // m) * m


# --------------------------------------------------------------------------- #
# Kernel
# --------------------------------------------------------------------------- #
def _ytdnn_kernel(feat_ref, hist_ref, w1f_ref, w1h_ref, b1_ref, w2_ref, b2_ref,
                  score_ref, *, onehot, E, T):
    """One batch tile of the YouTubeDNN forward.

    feat_ref : (TB, 2E)  compute dtype, packed [item_emb | user_emb]
    hist_ref : onehot -> (TB, T+1) int32  [masked hist ids | seq_len]
               dense  -> (TB, T*E) compute dtype, already masked & 1/len scaled
    w1f_ref  : (2E, H1) = [zeros ; W1_user]  so  feat @ w1f == user_emb @ W1_user
    w1h_ref  : onehot -> (ICp, H1) = padded hist_table @ W1_hist
               dense  -> (T*E, H1) = tile(W1_hist, (T, 1))
    """
    TB = feat_ref.shape[0]
    feat = feat_ref[...]

    # First Linear, user half: single K=2E MXU pass off the packed feature block
    # (item rows of w1f are zero, so they contribute nothing).
    h1 = jnp.dot(feat, w1f_ref[...], preferred_element_type=jnp.float32)

    if onehot:
        # Masked mean-pool + first Linear (hist half) fused into one MXU pass:
        # build the per-row item-count matrix from the int32 ids (invalid steps
        # were remapped to a zero row of the projected table in the wrapper),
        # matmul against the VMEM-resident projected table, scale by 1/len in
        # f32 post-accumulation (counts are small exact integers even in bf16).
        icp = w1h_ref.shape[0]
        idxs = hist_ref[...]                                       # (TB, T+1) i32
        len_f = jnp.maximum(idxs[:, T:T + 1].astype(jnp.float32), 1.0)
        item_iota = jax.lax.broadcasted_iota(jnp.int32, (TB, icp), 1)
        counts = jnp.zeros((TB, icp), jnp.float32)
        for t in range(T):                                         # static unroll
            counts = counts + jnp.where(item_iota == idxs[:, t:t + 1], 1.0, 0.0)
        h1_hist = jnp.dot(counts.astype(w1h_ref.dtype), w1h_ref[...],
                          preferred_element_type=jnp.float32) / len_f
    else:
        # Pre-gathered, pre-masked, pre-scaled history: one K=T*E MXU pass.
        h1_hist = jnp.dot(hist_ref[...], w1h_ref[...],
                          preferred_element_type=jnp.float32)

    h1 = jnp.maximum(h1 + h1_hist + b1_ref[...], 0.0)     # ReLU; Dropout=id (eval)
    h2 = jnp.dot(h1.astype(w2_ref.dtype), w2_ref[...],
                 preferred_element_type=jnp.float32) + b2_ref[...]
    h2 = jnp.maximum(h2, 0.0)                              # (TB, H2 = E)

    # score = sum(user_dnn_out * item_emb, dim=1); item half sits at lanes [0, E).
    item = feat_ref[:, :E]
    score_ref[...] = jnp.sum(h2 * item.astype(jnp.float32), axis=1, keepdims=True)


# --------------------------------------------------------------------------- #
# One-time weight prep (hoisted out of the per-call path)
# --------------------------------------------------------------------------- #
def prepare_params(params, T, *, compute_dtype=jnp.bfloat16, mode=None,
                   onehot_max_items=1024):
    E = params["user_embedding"].shape[1]
    H1 = params["w1"].shape[1]
    H2 = params["w2"].shape[1]
    item_count = params["hist_embedding"].shape[0]
    assert H2 == E, "last hidden unit must equal embedding_dim for the score dot"
    cdt = compute_dtype

    if mode is None:
        mode = "onehot" if item_count <= onehot_max_items else "dense"

    w1 = params["w1"].astype(jnp.float32)
    w1_user, w1_hist = w1[:E], w1[E:]

    consts = {
        # Packed features are [item | user]; zero rows kill the item half.
        "w1_feat": jnp.concatenate(
            [jnp.zeros((E, H1), jnp.float32), w1_user], axis=0).astype(cdt),
        "b1": params["b1"].reshape(1, H1).astype(jnp.float32),
        "w2": params["w2"].astype(cdt),
        "b2": params["b2"].reshape(1, H2).astype(jnp.float32),
        "user_table": params["user_embedding"].astype(cdt),
        "item_table": params["item_embedding"].astype(cdt),
    }

    if mode == "onehot":
        # >=1 spare zero row so invalid history steps map to a zero contribution.
        icp = _round_up(item_count + 1, 128)
        tbl = jnp.pad(params["hist_embedding"].astype(jnp.float32),
                      ((0, icp - item_count), (0, 0)))
        consts["w1_hist"] = (tbl @ w1_hist).astype(cdt)          # (ICp, H1)
        hist_cols = T + 1
    else:
        consts["hist_table"] = params["hist_embedding"].astype(cdt)
        consts["w1_hist"] = jnp.tile(w1_hist, (T, 1)).astype(cdt)  # (T*E, H1)
        icp = 0
        hist_cols = T * E

    meta = dict(mode=mode, E=E, T=T, H1=H1, H2=H2, icp=icp,
                sentinel=item_count, hist_cols=hist_cols, cdt=cdt)
    return consts, meta


def _pick_batch_tile(B, requested, meta):
    if requested is not None:
        tb = requested
    else:
        # Target 2048-4096 rows/step but keep >=4 grid steps when B allows
        # (v7x: two TensorCores share the "parallel" grid axis).
        quarter = max(B // 4, 1)
        tb = min(4096, max(256, (quarter // 256) * 256))
    if meta["mode"] == "onehot" and meta["icp"] > 0:
        # Keep the in-kernel (TB, ICp) f32 count matrix <= ~4 MiB.
        cap = max(256, (4 * 1024 * 1024 // (4 * meta["icp"]) // 256) * 256)
        tb = min(tb, cap)
    return _round_up(max(tb, 8), 8)


# --------------------------------------------------------------------------- #
# Forward wrapper
# --------------------------------------------------------------------------- #
def _forward(consts, meta, user_id, hist_item_seq, target_item, seq_len,
             batch_tile):
    E, T = meta["E"], meta["T"]
    H1, H2 = meta["H1"], meta["H2"]
    cdt = meta["cdt"]
    B = user_id.shape[0]
    seq_len_i = jnp.asarray(seq_len, jnp.int32)

    # Packed per-row features: [item_emb | user_emb]  (glue gathers, fused by XLA)
    feat = jnp.concatenate([consts["item_table"][target_item],
                            consts["user_table"][user_id]], axis=1).astype(cdt)

    if meta["mode"] == "onehot":
        pos = jnp.arange(T, dtype=jnp.int32)[None, :]
        idx = jnp.where(pos < seq_len_i[:, None],
                        hist_item_seq.astype(jnp.int32),
                        jnp.int32(meta["sentinel"]))      # invalid -> zero row
        hist_in = jnp.concatenate([idx, seq_len_i[:, None]], axis=1)  # (B, T+1)
    else:
        gathered = consts["hist_table"][hist_item_seq].astype(jnp.float32)
        mask = (jnp.arange(T)[None, :] < seq_len_i[:, None]).astype(jnp.float32)
        inv = 1.0 / jnp.maximum(seq_len_i.astype(jnp.float32), 1.0)
        hist_in = ((gathered * mask[:, :, None]) * inv[:, None, None]
                   ).reshape(B, T * E).astype(cdt)

    TB = _pick_batch_tile(B, batch_tile, meta)
    B_pad = _round_up(B, TB)
    pad = B_pad - B
    if pad:
        # Padded rows: item half of feat is zero -> score 0; sliced off below.
        feat = jnp.pad(feat, ((0, pad), (0, 0)))
        hist_in = jnp.pad(hist_in, ((0, pad), (0, 0)))

    kernel = functools.partial(_ytdnn_kernel,
                               onehot=(meta["mode"] == "onehot"), E=E, T=T)

    batch_spec = lambda shape: pl.BlockSpec(shape, lambda i: (i, 0))
    const_spec = lambda shape: pl.BlockSpec(shape, lambda i: (0, 0))

    out = pl.pallas_call(
        kernel,
        out_shape=jax.ShapeDtypeStruct((B_pad, 1), jnp.float32),
        grid_spec=pltpu.PrefetchScalarGridSpec(
            num_scalar_prefetch=0,
            grid=(B_pad // TB,),
            in_specs=[
                batch_spec((TB, 2 * E)),                 # packed [item | user]
                batch_spec((TB, meta["hist_cols"])),     # hist ids+len OR dense hist
                const_spec((2 * E, H1)),                 # [0 ; W1_user] (resident)
                const_spec(consts["w1_hist"].shape),     # projected / tiled W1_hist
                const_spec((1, H1)),                     # b1
                const_spec((H1, H2)),                    # w2
                const_spec((1, H2)),                     # b2
            ],
            out_specs=pl.BlockSpec((TB, 1), lambda i: (i, 0)),
        ),
        compiler_params=pltpu.CompilerParams(
            dimension_semantics=("parallel",),
            vmem_limit_bytes=32 * 1024 * 1024,           # v5e default is only 16 MiB
        ),
    )(feat, hist_in, consts["w1_feat"], consts["w1_hist"],
      consts["b1"], consts["w2"], consts["b2"])
    return out[:B, 0]                                    # (B,)


def make_forward_fn(params, T, *, compute_dtype=jnp.bfloat16, mode=None,
                    batch_tile=None):
    """Returns a jitted forward(user_id, hist_item_seq, target_item, seq_len)."""
    consts, meta = prepare_params(params, T, compute_dtype=compute_dtype, mode=mode)

    @jax.jit
    def fwd(user_id, hist_item_seq, target_item, seq_len):
        return _forward(consts, meta, user_id, hist_item_seq, target_item,
                        seq_len, batch_tile)
    return fwd


# --------------------------------------------------------------------------- #
# Init + pure-JAX reference (test harness)
# --------------------------------------------------------------------------- #
def init_params(key, user_count, item_count, embedding_dim=16, hidden_units=(64, 16)):
    """Deterministic init mirroring the PyTorch _init_weights."""
    k = jax.random.split(key, 5)
    E = embedding_dim
    H1, H2 = hidden_units
    user_table = 0.01 * jax.random.normal(k[0], (user_count, E), jnp.float32)
    item_table = 0.01 * jax.random.normal(k[1], (item_count, E), jnp.float32)
    hist_table = 0.01 * jax.random.normal(k[2], (item_count, E), jnp.float32)
    w1 = jax.random.normal(k[3], (2 * E, H1), jnp.float32) * jnp.sqrt(2.0 / (2 * E + H1))
    w2 = jax.random.normal(k[4], (H1, H2), jnp.float32) * jnp.sqrt(2.0 / (H1 + H2))
    return {
        "user_embedding": user_table,
        "item_embedding": item_table,
        "hist_embedding": hist_table,
        "w1": w1, "b1": jnp.zeros((1, H1), jnp.float32),
        "w2": w2, "b2": jnp.zeros((1, H2), jnp.float32),
    }


def reference_forward(params, user_id, hist_item_seq, target_item, seq_len):
    """Pure-JAX reference matching the PyTorch forward (eval mode)."""
    user_emb = params["user_embedding"][user_id]
    hist_emb = params["hist_embedding"][hist_item_seq]
    T = hist_item_seq.shape[1]
    mask = (jnp.arange(T)[None, :] < seq_len[:, None]).astype(jnp.float32)[:, :, None]
    pooled = (hist_emb * mask).sum(axis=1) / jnp.maximum(
        seq_len[:, None].astype(jnp.float32), 1.0)
    feat = jnp.concatenate([user_emb, pooled], axis=1)
    h1 = jnp.maximum(feat @ params["w1"] + params["b1"], 0.0)
    h2 = jnp.maximum(h1 @ params["w2"] + params["b2"], 0.0)
    item_emb = params["item_embedding"][target_item]
    return jnp.sum(h2 * item_emb, axis=1)


if __name__ == "__main__":
    # Small, module-consistent shapes; B not a multiple of the tile so the
    # padding path is exercised.
    USER_COUNT, ITEM_COUNT = 64, 100
    EMBEDDING_DIM = 16
    HIDDEN_UNITS = (64, 16)
    B, T = 200, 8

    key = jax.random.PRNGKey(0)
    pkey, dkey = jax.random.split(key)
    params = init_params(pkey, USER_COUNT, ITEM_COUNT, EMBEDDING_DIM, HIDDEN_UNITS)

    dk = jax.random.split(dkey, 4)
    user_id = jax.random.randint(dk[0], (B,), 0, USER_COUNT, dtype=jnp.int32)
    hist_item_seq = jax.random.randint(dk[1], (B, T), 0, ITEM_COUNT, dtype=jnp.int32)
    target_item = jax.random.randint(dk[2], (B,), 0, ITEM_COUNT, dtype=jnp.int32)
    seq_len = jax.random.randint(dk[3], (B,), 1, T + 1, dtype=jnp.int32)

    ref = reference_forward(params, user_id, hist_item_seq, target_item, seq_len)

    # (mode, dtype, batch_tile, atol, rtol): f32 paths verify exactness, bf16
    # paths exercise the fast DMA/MXU configuration; batch_tile=128 forces a
    # 2-step grid so the pipelined/tiled path is covered.
    cases = [
        ("onehot", jnp.float32, 128, 1e-5, 1e-5),
        ("onehot", jnp.bfloat16, None, 5e-5, 5e-2),
        ("dense",  jnp.float32, 128, 1e-5, 1e-5),
        ("dense",  jnp.bfloat16, None, 5e-5, 5e-2),
    ]
    for mode, dt, tb, atol, rtol in cases:
        fwd = make_forward_fn(params, T, compute_dtype=dt, mode=mode, batch_tile=tb)
        out = jax.block_until_ready(fwd(user_id, hist_item_seq, target_item, seq_len))
        assert out.shape == (B,), (mode, dt, out.shape)
        assert jnp.allclose(out, ref, atol=atol, rtol=rtol), (mode, dt, out, ref)

    print("KERNEL_OK")
</pallas_src>

<mosaic_0001>
module attributes {stable_mosaic.version = 11 : i64} {
  func.func @_ytdnn_kernel(%arg0: i32, %arg1: memref<128x32xf32, #tpu.memory_space<vmem>>, %arg2: memref<128x9xi32, #tpu.memory_space<vmem>>, %arg3: memref<32x64xf32, #tpu.memory_space<vmem>>, %arg4: memref<128x64xf32, #tpu.memory_space<vmem>>, %arg5: memref<1x64xf32, #tpu.memory_space<vmem>>, %arg6: memref<64x16xf32, #tpu.memory_space<vmem>>, %arg7: memref<1x16xf32, #tpu.memory_space<vmem>>, %arg8: memref<128x1xf32, #tpu.memory_space<vmem>>) attributes {dimension_semantics = [#tpu.dimension_semantics<parallel>], iteration_bounds = array<i64: 2>, scalar_prefetch = 0 : i64, scratch_operands = 0 : i64, tpu.core_type = #tpu.core_type<tc>, window_params = [{transform_indices = @transform_0, window_bounds = array<i64: 128, 32>}, {transform_indices = @transform_1, window_bounds = array<i64: 128, 9>}, {pipeline_mode = #tpu.pipeline_mode<synchronous>, transform_indices = @transform_2, window_bounds = array<i64: 32, 64>}, {pipeline_mode = #tpu.pipeline_mode<synchronous>, transform_indices = @transform_3, window_bounds = array<i64: 128, 64>}, {pipeline_mode = #tpu.pipeline_mode<synchronous>, transform_indices = @transform_4, window_bounds = array<i64: 1, 64>}, {pipeline_mode = #tpu.pipeline_mode<synchronous>, transform_indices = @transform_5, window_bounds = array<i64: 64, 16>}, {pipeline_mode = #tpu.pipeline_mode<synchronous>, transform_indices = @transform_6, window_bounds = array<i64: 1, 16>}, {transform_indices = @transform_7, window_bounds = array<i64: 128, 1>}]} {
    %c0 = arith.constant 0 : index
    %c0_0 = arith.constant 0 : index
    %0 = vector.load %arg1[%c0, %c0_0] : memref<128x32xf32, #tpu.memory_space<vmem>>, vector<128x32xf32>
    %c0_1 = arith.constant 0 : index
    %c0_2 = arith.constant 0 : index
    %1 = vector.load %arg3[%c0_1, %c0_2] : memref<32x64xf32, #tpu.memory_space<vmem>>, vector<32x64xf32>
    %cst = arith.constant dense<0.000000e+00> : vector<128x64xf32>
    %2 = tpu.matmul %0, %1, %cst {dimension_numbers = #tpu.dot_dimension_numbers<[1], [0], [0], [1], [0, 0, 1, 1], [], []>} : vector<128x32xf32>, vector<32x64xf32>, vector<128x64xf32> -> vector<128x64xf32>
    %c0_3 = arith.constant 0 : index
    %c0_4 = arith.constant 0 : index
    %3 = vector.load %arg2[%c0_3, %c0_4] : memref<128x9xi32, #tpu.memory_space<vmem>>, vector<128x9xi32>
    %4 = vector.extract_strided_slice %3 {offsets = [0, 8], sizes = [128, 1], strides = [1, 1]} : vector<128x9xi32> to vector<128x1xi32>
    %5 = arith.sitofp %4 : vector<128x1xi32> to vector<128x1xf32>
    %cst_5 = arith.constant 1.000000e+00 : f32
    %6 = vector.broadcast %cst_5 : f32 to vector<128x1xf32>
    %7 = arith.maximumf %5, %6 : vector<128x1xf32>
    %8 = tpu.iota {dimensions = array<i32: 1>} : vector<128x128xi32>
    %cst_6 = arith.constant 0.000000e+00 : f32
    %9 = vector.broadcast %cst_6 : f32 to vector<128x128xf32>
    %10 = vector.extract_strided_slice %3 {offsets = [0, 0], sizes = [128, 1], strides = [1, 1]} : vector<128x9xi32> to vector<128x1xi32>
    %11 = vector.broadcast %10 : vector<128x1xi32> to vector<128x128xi32>
    %12 = arith.cmpi eq, %8, %11 : vector<128x128xi32>
    %cst_7 = arith.constant 1.000000e+00 : f32
    %cst_8 = arith.constant 0.000000e+00 : f32
    %13 = vector.broadcast %cst_7 : f32 to vector<128x128xf32>
    %14 = vector.broadcast %cst_8 : f32 to vector<128x128xf32>
    %15 = arith.select %12, %13, %14 : vector<128x128xi1>, vector<128x128xf32>
    %16 = arith.addf %9, %15 : vector<128x128xf32>
    %17 = vector.extract_strided_slice %3 {offsets = [0, 1], sizes = [128, 1], strides = [1, 1]} : vector<128x9xi32> to vector<128x1xi32>
    %18 = vector.broadcast %17 : vector<128x1xi32> to vector<128x128xi32>
    %19 = arith.cmpi eq, %8, %18 : vector<128x128xi32>
    %cst_9 = arith.constant 1.000000e+00 : f32
    %cst_10 = arith.constant 0.000000e+00 : f32
    %20 = vector.broadcast %cst_9 : f32 to vector<128x128xf32>
    %21 = vector.broadcast %cst_10 : f32 to vector<128x128xf32>
    %22 = arith.select %19, %20, %21 : vector<128x128xi1>, vector<128x128xf32>
    %23 = arith.addf %16, %22 : vector<128x128xf32>
    %24 = vector.extract_strided_slice %3 {offsets = [0, 2], sizes = [128, 1], strides = [1, 1]} : vector<128x9xi32> to vector<128x1xi32>
    %25 = vector.broadcast %24 : vector<128x1xi32> to vector<128x128xi32>
    %26 = arith.cmpi eq, %8, %25 : vector<128x128xi32>
    %cst_11 = arith.constant 1.000000e+00 : f32
    %cst_12 = arith.constant 0.000000e+00 : f32
    %27 = vector.broadcast %cst_11 : f32 to vector<128x128xf32>
    %28 = vector.broadcast %cst_12 : f32 to vector<128x128xf32>
    %29 = arith.select %26, %27, %28 : vector<128x128xi1>, vector<128x128xf32>
    %30 = arith.addf %23, %29 : vector<128x128xf32>
    %31 = vector.extract_strided_slice %3 {offsets = [0, 3], sizes = [128, 1], strides = [1, 1]} : vector<128x9xi32> to vector<128x1xi32>
    %32 = vector.broadcast %31 : vector<128x1xi32> to vector<128x128xi32>
    %33 = arith.cmpi eq, %8, %32 : vector<128x128xi32>
    %cst_13 = arith.constant 1.000000e+00 : f32
    %cst_14 = arith.constant 0.000000e+00 : f32
    %34 = vector.broadcast %cst_13 : f32 to vector<128x128xf32>
    %35 = vector.broadcast %cst_14 : f32 to vector<128x128xf32>
    %36 = arith.select %33, %34, %35 : vector<128x128xi1>, vector<128x128xf32>
    %37 = arith.addf %30, %36 : vector<128x128xf32>
    %38 = vector.extract_strided_slice %3 {offsets = [0, 4], sizes = [128, 1], strides = [1, 1]} : vector<128x9xi32> to vector<128x1xi32>
    %39 = vector.broadcast %38 : vector<128x1xi32> to vector<128x128xi32>
    %40 = arith.cmpi eq, %8, %39 : vector<128x128xi32>
    %cst_15 = arith.constant 1.000000e+00 : f32
    %cst_16 = arith.constant 0.000000e+00 : f32
    %41 = vector.broadcast %cst_15 : f32 to vector<128x128xf32>
    %42 = vector.broadcast %cst_16 : f32 to vector<128x128xf32>
    %43 = arith.select %40, %41, %42 : vector<128x128xi1>, vector<128x128xf32>
    %44 = arith.addf %37, %43 : vector<128x128xf32>
    %45 = vector.extract_strided_slice %3 {offsets = [0, 5], sizes = [128, 1], strides = [1, 1]} : vector<128x9xi32> to vector<128x1xi32>
    %46 = vector.broadcast %45 : vector<128x1xi32> to vector<128x128xi32>
    %47 = arith.cmpi eq, %8, %46 : vector<128x128xi32>
    %cst_17 = arith.constant 1.000000e+00 : f32
    %cst_18 = arith.constant 0.000000e+00 : f32
    %48 = vector.broadcast %cst_17 : f32 to vector<128x128xf32>
    %49 = vector.broadcast %cst_18 : f32 to vector<128x128xf32>
    %50 = arith.select %47, %48, %49 : vector<128x128xi1>, vector<128x128xf32>
    %51 = arith.addf %44, %50 : vector<128x128xf32>
    %52 = vector.extract_strided_slice %3 {offsets = [0, 6], sizes = [128, 1], strides = [1, 1]} : vector<128x9xi32> to vector<128x1xi32>
    %53 = vector.broadcast %52 : vector<128x1xi32> to vector<128x128xi32>
    %54 = arith.cmpi eq, %8, %53 : vector<128x128xi32>
    %cst_19 = arith.constant 1.000000e+00 : f32
    %cst_20 = arith.constant 0.000000e+00 : f32
    %55 = vector.broadcast %cst_19 : f32 to vector<128x128xf32>
    %56 = vector.broadcast %cst_20 : f32 to vector<128x128xf32>
    %57 = arith.select %54, %55, %56 : vector<128x128xi1>, vector<128x128xf32>
    %58 = arith.addf %51, %57 : vector<128x128xf32>
    %59 = vector.extract_strided_slice %3 {offsets = [0, 7], sizes = [128, 1], strides = [1, 1]} : vector<128x9xi32> to vector<128x1xi32>
    %60 = vector.broadcast %59 : vector<128x1xi32> to vector<128x128xi32>
    %61 = arith.cmpi eq, %8, %60 : vector<128x128xi32>
    %cst_21 = arith.constant 1.000000e+00 : f32
    %cst_22 = arith.constant 0.000000e+00 : f32
    %62 = vector.broadcast %cst_21 : f32 to vector<128x128xf32>
    %63 = vector.broadcast %cst_22 : f32 to vector<128x128xf32>
    %64 = arith.select %61, %62, %63 : vector<128x128xi1>, vector<128x128xf32>
    %65 = arith.addf %58, %64 : vector<128x128xf32>
    %c0_23 = arith.constant 0 : index
    %c0_24 = arith.constant 0 : index
    %66 = vector.load %arg4[%c0_23, %c0_24] : memref<128x64xf32, #tpu.memory_space<vmem>>, vector<128x64xf32>
    %cst_25 = arith.constant dense<0.000000e+00> : vector<128x64xf32>
    %67 = tpu.matmul %65, %66, %cst_25 {dimension_numbers = #tpu.dot_dimension_numbers<[1], [0], [0], [1], [0, 0, 1, 1], [], []>} : vector<128x128xf32>, vector<128x64xf32>, vector<128x64xf32> -> vector<128x64xf32>
    %68 = vector.broadcast %7 : vector<128x1xf32> to vector<128x64xf32>
    %69 = arith.divf %67, %68 : vector<128x64xf32>
    %70 = arith.addf %2, %69 : vector<128x64xf32>
    %c0_26 = arith.constant 0 : index
    %c0_27 = arith.constant 0 : index
    %71 = vector.load %arg5[%c0_26, %c0_27] : memref<1x64xf32, #tpu.memory_space<vmem>>, vector<1x64xf32>
    %72 = vector.broadcast %71 : vector<1x64xf32> to vector<128x64xf32>
    %73 = arith.addf %70, %72 : vector<128x64xf32>
    %cst_28 = arith.constant 0.000000e+00 : f32
    %74 = vector.broadcast %cst_28 : f32 to vector<128x64xf32>
    %75 = arith.maximumf %73, %74 : vector<128x64xf32>
    %c0_29 = arith.constant 0 : index
    %c0_30 = arith.constant 0 : index
    %76 = vector.load %arg6[%c0_29, %c0_30] : memref<64x16xf32, #tpu.memory_space<vmem>>, vector<64x16xf32>
    %cst_31 = arith.constant dense<0.000000e+00> : vector<128x16xf32>
    %77 = tpu.matmul %75, %76, %cst_31 {dimension_numbers = #tpu.dot_dimension_numbers<[1], [0], [0], [1], [0, 0, 1, 1], [], []>} : vector<128x64xf32>, vector<64x16xf32>, vector<128x16xf32> -> vector<128x16xf32>
    %c0_32 = arith.constant 0 : index
    %c0_33 = arith.constant 0 : index
    %78 = vector.load %arg7[%c0_32, %c0_33] : memref<1x16xf32, #tpu.memory_space<vmem>>, vector<1x16xf32>
    %79 = vector.broadcast %78 : vector<1x16xf32> to vector<128x16xf32>
    %80 = arith.addf %77, %79 : vector<128x16xf32>
    %cst_34 = arith.constant 0.000000e+00 : f32
    %81 = vector.broadcast %cst_34 : f32 to vector<128x16xf32>
    %82 = arith.maximumf %80, %81 : vector<128x16xf32>
    %c0_35 = arith.constant 0 : index
    %c0_36 = arith.constant 0 : index
    %83 = vector.load %arg1[%c0_35, %c0_36] : memref<128x32xf32, #tpu.memory_space<vmem>>, vector<128x16xf32>
    %84 = arith.mulf %82, %83 : vector<128x16xf32>
    %cst_37 = arith.constant dense<0.000000e+00> : vector<128xf32>
    %85 = vector.multi_reduction <add>, %84, %cst_37 [1] : vector<128x16xf32> to vector<128xf32>
    %86 = vector.shape_cast %85 : vector<128xf32> to vector<128x1xf32>
    %c0_38 = arith.constant 0 : index
    %c0_39 = arith.constant 0 : index
    %87 = vector.load %arg8[%c0_38, %c0_39] : memref<128x1xf32, #tpu.memory_space<vmem>>, vector<128x1xf32>
    tpu.vector_store %arg8[%c0_38, %c0_39], %86 {strides = array<i32>} : memref<128x1xf32, #tpu.memory_space<vmem>>, vector<128x1xf32>,
    return
  }
  func.func @transform_0(%arg0: i32) -> (i32, i32) {
    %c0_i32 = arith.constant 0 : i32
    %c0_i32_0 = arith.constant 0 : i32
    return %arg0, %c0_i32 : i32, i32
  }
  func.func @transform_1(%arg0: i32) -> (i32, i32) {
    %c0_i32 = arith.constant 0 : i32
    %c0_i32_0 = arith.constant 0 : i32
    return %arg0, %c0_i32 : i32, i32
  }
  func.func @transform_2(%arg0: i32) -> (i32, i32) {
    %c0_i32 = arith.constant 0 : i32
    %c0_i32_0 = arith.constant 0 : i32
    %c0_i32_1 = arith.constant 0 : i32
    return %c0_i32, %c0_i32_0 : i32, i32
  }
  func.func @transform_3(%arg0: i32) -> (i32, i32) {
    %c0_i32 = arith.constant 0 : i32
    %c0_i32_0 = arith.constant 0 : i32
    %c0_i32_1 = arith.constant 0 : i32
    return %c0_i32, %c0_i32_0 : i32, i32
  }
  func.func @transform_4(%arg0: i32) -> (i32, i32) {
    %c0_i32 = arith.constant 0 : i32
    %c0_i32_0 = arith.constant 0 : i32
    %c0_i32_1 = arith.constant 0 : i32
    return %c0_i32, %c0_i32_0 : i32, i32
  }
  func.func @transform_5(%arg0: i32) -> (i32, i32) {
    %c0_i32 = arith.constant 0 : i32
    %c0_i32_0 = arith.constant 0 : i32
    %c0_i32_1 = arith.constant 0 : i32
    return %c0_i32, %c0_i32_0 : i32, i32
  }
  func.func @transform_6(%arg0: i32) -> (i32, i32) {
    %c0_i32 = arith.constant 0 : i32
    %c0_i32_0 = arith.constant 0 : i32
    %c0_i32_1 = arith.constant 0 : i32
    return %c0_i32, %c0_i32_0 : i32, i32
  }
  func.func @transform_7(%arg0: i32) -> (i32, i32) {
    %c0_i32 = arith.constant 0 : i32
    %c0_i32_0 = arith.constant 0 : i32
    return %arg0, %c0_i32 : i32, i32
  }
}

</mosaic_0001>

<bundles_post_ra>
// kernel: fwd.1
= control target key start
LH: loop header
LB: loop body
LE: loop exit
PB: predicated region body
PF: predicated region fallthrough
CT: control target
= control target key end

     0   :  { %s2554_s24 = smov 0   ;;  %s3737_s0 = inlined_call_operand.vmem [shape: f32[256,32], index: 0, kind: input, shape index: {}]   ;;  %s3738_s1 = inlined_call_operand.vmem [shape: s32[256,9], index: 1, kind: input, shape index: {}]   ;;  %s3739_s2 = inlined_call_operand.vmem [shape: f32[32,64], index: 2, kind: input, shape index: {}]   ;;  %s3740_s3 = inlined_call_operand.vmem [shape: f32[128,64], index: 3, kind: input, shape index: {}]   ;;  %s3741_s4 = inlined_call_operand.vmem [shape: f32[1,64], index: 4, kind: input, shape index: {}]   ;;  %s3742_s5 = inlined_call_operand.vmem [shape: f32[64,16], index: 5, kind: input, shape index: {}]   ;;  %s3743_s6 = inlined_call_operand.vmem [shape: f32[1,16], index: 6, kind: input, shape index: {}]   ;;  %s3744_s7 = inlined_call_operand.vmem [shape: f32[256,1], index: 7, kind: output, shape index: {}]  }
   0x1 LB: > { %s2023_s25 = sadd.s32 4294967295, %s2502_s24   ;;  %p2027_p0 = scmp.ge.s32.totalorder %s2502_s24, 1  ;;  %s2502_s24 = sphi %s2554_s24, %s17_s24  }
   0x2   : > { %p249_p1 = scmp.lt.s32.totalorder %s2502_s24, 3 }
   0x4   : > { %p250_p2 = pnand %p2027_p0, %p249_p1 }
   0x6   : > { %253 = sbr.rel (%p250_p2) target bundleno = 1169 (0x491), region = 48 }
   0xd   : > { %s2028_s26 = sshll.u32 %s2023_s25, 4  ;;  %v3745_v0 = vmov 4   ;;  %v3749_v1 = vmov 0   ;;  %v3751_v5 = vmov 1   ;;  %v3759_v7 = vmov 2   ;;  %v1142_v25 = vld [vmem:[%s3740_s3] sm:$0xff] }
   0xe   : > { %2360 = vset.pattern.permute.xlu0 %v3745_v0  ;;  %2352 = vset.pattern.permute.xlu1 %v3749_v1  ;;  %p287_p3 = scmp.lt.s32.totalorder %s2028_s26, 31  ;;  %v3755_v16 = vmov 3   ;;  %v3747_v19 = vmov 5   ;;  %v3753_v20 = vmov 6   ;;  %v3757_v22 = vmov 7   ;;  %v1143_v26 = vld [vmem:[%s3740_s3 + $0x8] sm:$0xff] }
   0xf   : > { %v2274_v27 = vpack.c.bf16 %v1143_v26, %v1142_v25  ;;  %v1144_v30 = vld [vmem:[%s3740_s3 + $0x10] sm:$0xff]  ;;  %v1145_v31 = vld [vmem:[%s3740_s3 + $0x18] sm:$0xff]  ;;  %v1146_v34 = vld [vmem:[%s3740_s3 + $0x20] sm:$0xff]  ;;  %vm1415_vm0 = vcmask 261120  }
  0x10   : > { %s3810_s26 = smov (!%p287_p3, %s2028_s26), 31  ;;  %v2278_v32 = vpack.c.bf16 %v1145_v31, %v1144_v30  ;;  %v1147_v35 = vld [vmem:[%s3740_s3 + $0x28] sm:$0xff]  ;;  %v1148_v39 = vld [vmem:[%s3740_s3 + $0x30] sm:$0xff]  ;;  %v1149_v40 = vld [vmem:[%s3740_s3 + $0x38] sm:$0xff] }
  0x11   : > { %s2564_s27 = sshll.u32 %s3810_s26, 3  ;;  %2275 = vmatprep.subr.bf16.mxu0 %v2274_v27  ;;  %v2282_v37 = vpack.c.bf16 %v1147_v35, %v1146_v34  ;;  %v2286_v41 = vpack.c.bf16 %v1149_v40, %v1148_v39  ;;  %v1150_v44 = vld [vmem:[%s3740_s3 + $0x40] sm:$0xff]  ;;  %v1151_v45 = vld [vmem:[%s3740_s3 + $0x48] sm:$0xff]  ;;  %v1152_v49 = vld [vmem:[%s3740_s3 + $0x50] sm:$0xff] }
  0x12   : > { %s2570_s30 = scalar_lea.vmem %s3738_s1, %s2564_s27  ;;  %2277 = vmatpush3.bf16.msra.mxu0 %v2274_v27  ;;  %v2290_v46 = vpack.c.bf16 %v1151_v45, %v1150_v44  ;;  %v1153_v50 = vld [vmem:[%s3740_s3 + $0x58] sm:$0xff]  ;;  %v1154_v54 = vld [vmem:[%s3740_s3 + $0x60] sm:$0xff]  ;;  %v1155_v55 = vld [vmem:[%s3740_s3 + $0x68] sm:$0xff]  ;;  %s2861_s10 = scalar_lea.vmem %s3737_s0, %s2564_s27 }
  0x13   : > { %v2573_v2 = vld [vmem:[%s2570_s30 + $0x8] sm:$0xff]  ;;  %v2576_v3 = vld [vmem:[%s2570_s30] sm:$0xff]  ;;  %v2581_v4 = vld [vmem:[%s2570_s30 + $0x10] sm:$0xff]  ;;  %2279 = vmatprep.subr.bf16.mxu0 %v2278_v32  ;;  %v2294_v51 = vpack.c.bf16 %v1153_v50, %v1152_v49  ;;  %v2298_v56 = vpack.c.bf16 %v1155_v55, %v1154_v54  ;;  %s3700_s11 = scalar_lea.vmem %s3744_s7, %s2564_s27 }
  0x14   : > { %378 = vperm.xlu1 %2352, %v2573_v2   ;;  %759 = vperm.xlu0 %2360, %v2576_v3   ;;  %v2587_v6 = vld [vmem:[%s2570_s30 + $0x18] sm:$0xff]  ;;  %v2592_v8 = vld [vmem:[%s2570_s30 + $0x40] sm:$0xff]  ;;  %v2597_v9 = vld [vmem:[%s2570_s30 + $0x48] sm:$0xff] }
  0x15   : > { %v2607_v10 = vld [vmem:[%s2570_s30 + $0x20] sm:$0xff]  ;;  %v2613_v11 = vld [vmem:[%s2570_s30 + $0x30] sm:$0xff]  ;;  %v2619_v12 = vld [vmem:[%s2570_s30 + $0x58] sm:$0xff] }
  0x16   : > { %v2624_v13 = vld [vmem:[%s2570_s30 + $0x60] sm:$0xff]  ;;  %v2633_v14 = vld [vmem:[%s2570_s30 + $0x38] sm:$0xff]  ;;  %v2641_v15 = vld [vmem:[%s2570_s30 + $0x68] sm:$0xff]  ;;  %2281 = vmatpush3.bf16.msra.mxu0 %v2278_v32 }
  0x17   : > { %v2647_v17 = vld [vmem:[%s2570_s30 + $0x70] sm:$0xff]  ;;  %v2650_v18 = vld [vmem:[%s2570_s30 + $0x28] sm:$0xff]  ;;  %v2684_v21 = vld [vmem:[%s2570_s30 + $0x78] sm:$0xff]  ;;  %2283 = vmatprep.subr.bf16.mxu0 %v2282_v37 }
  0x18   : > { %2353 = vset.pattern.permute.xlu1 %v3751_v5  ;;  %765 = vperm.xlu0 %2360, %v2581_v4   ;;  %v1156_v58 = vld [vmem:[%s3740_s3 + $0x70] sm:$0xff]  ;;  %v1157_v59 = vld [vmem:[%s3740_s3 + $0x78] sm:$0xff]  ;;  %v321_v27 = vld [vmem:[%s3739_s2 + $0x8] sm:$0xff] }
  0x19   : > { %474 = vperm.xlu1 %2353, %v2573_v2   ;;  %v2302_v61 = vpack.c.bf16 %v1157_v59, %v1156_v58  ;;  %v322_v34 = vld [vmem:[%s3739_s2 + $0x10] sm:$0xff]  ;;  %v307_v44 = vld [vmem:[%s2861_s10 + $0x18] sm:$0xff] }
  0x1a   : > { %2285 = vmatpush3.bf16.msra.mxu0 %v2282_v37  ;;  %v2846_v35 = vld [vmem:[%s2570_s30 + $0x50] sm:$0xff] }
  0x1b   : > { %2287 = vmatprep.subr.bf16.mxu0 %v2286_v41 }
  0x1c   : > { %768 = vperm.xlu0 %2360, %v2587_v6  }
  0x1d   : > { %2354 = vset.pattern.permute.xlu1 %v3759_v7 }
  0x1e   : > { %567 = vperm.xlu1 %2354, %v2576_v3   ;;  %2289 = vmatpush3.bf16.msra.mxu0 %v2286_v41  ;;  %v306_v41 = vld [vmem:[%s2861_s10 + $0x10] sm:$0xff] }
  0x1f   : > { %2291 = vmatprep.subr.bf16.mxu0 %v2290_v46  ;;  %2213 = vmatprep.mubr.msk.f32.mxu1 %vm1415_vm0, %v306_v41 }
  0x20   : > { %783 = vperm.xlu0 %2360, %v2592_v8  }
  0x22   : > { %2355 = vset.pattern.permute.xlu1 %v3749_v1  ;;  %2293 = vmatpush3.bf16.msra.mxu0 %v2290_v46 }
  0x23   : > { %381 = vperm.xlu1 %2355, %v2581_v4   ;;  %2295 = vmatprep.subr.bf16.mxu0 %v2294_v51 }
  0x24   : > { %786 = vperm.xlu0 %2360, %v2597_v9  }
  0x26   : > { %2297 = vmatpush3.bf16.msra.mxu0 %v2294_v51 }
  0x27   : > { %2356 = vset.pattern.permute.xlu1 %v3751_v5  ;;  %2299 = vmatprep.subr.bf16.mxu0 %v2298_v56 }
  0x28   : > { %2401 = vset.pattern.permute.xlu0 %v3749_v1  ;;  %477 = vperm.xlu1 %2356, %v2581_v4  }
  0x29   : > { %375 = vperm.xlu0 %2401, %v2576_v3  }
  0x2a   : > { %2301 = vmatpush3.bf16.msra.mxu0 %v2298_v56 }
  0x2b   : > { %2303 = vmatprep.subr.bf16.mxu0 %v2302_v61 }
  0x2c   : > { %2357 = vset.pattern.permute.xlu1 %v3749_v1 }
  0x2d   : > { %387 = vperm.xlu0 %2401, %v2607_v10   ;;  %384 = vperm.xlu1 %2357, %v2587_v6  }
  0x2e   : > { %2305 = vmatpush3.bf16.msra.mxu0 %v2302_v61 }
  0x31   : > { %393 = vperm.xlu0 %2401, %v2613_v11   ;;  %2358 = vset.pattern.permute.xlu1 %v3751_v5 }
  0x32   : > { %480 = vperm.xlu1 %2358, %v2587_v6  }
  0x35   : > { %408 = vperm.xlu0 %2401, %v2619_v12  }
  0x36   : > { %2359 = vset.pattern.permute.xlu1 %v3759_v7 }
  0x37   : > { %573 = vperm.xlu1 %2359, %v2581_v4  }
  0x39   : > { %411 = vperm.xlu0 %2401, %v2624_v13  }
  0x3b   : > { %576 = vperm.xlu1 %2359, %v2587_v6  }
  0x3d   : > { %2403 = vset.pattern.permute.xlu0 %v3751_v5 }
  0x3e   : > { %471 = vperm.xlu0 %2403, %v2576_v3  }
  0x3f   : > { %2361 = vset.pattern.permute.xlu1 %v3745_v0 }
  0x40   : > { %762 = vperm.xlu1 %2361, %v2573_v2  }
  0x42   : > { %492 = vperm.xlu0 %2403, %v2633_v14  }
  0x44   : > { %2362 = vset.pattern.permute.xlu1 %v3751_v5 }
  0x45   : > { %483 = vperm.xlu1 %2362, %v2607_v10  }
  0x46   : > { %495 = vperm.xlu0 %2403, %v2592_v8  }
  0x49   : > { %2363 = vset.pattern.permute.xlu1 %v3755_v16 }
  0x4a   : > { %510 = vperm.xlu0 %2403, %v2641_v15   ;;  %669 = vperm.xlu1 %2363, %v2581_v4  }
  0x4e   : > { %513 = vperm.xlu0 %2403, %v2647_v17   ;;  %2364 = vset.pattern.permute.xlu1 %v3749_v1 }
  0x4f   : > { %390 = vperm.xlu1 %2364, %v2650_v18  }
  0x52   : > { %2415 = vset.pattern.permute.xlu0 %v3755_v16 }
  0x53   : > { %663 = vperm.xlu0 %2415, %v2576_v3   ;;  %2365 = vset.pattern.permute.xlu1 %v3751_v5 }
  0x54   : > { %486 = vperm.xlu1 %2365, %v2650_v18  }
  0x57   : > { %666 = vperm.xlu0 %2415, %v2573_v2  }
  0x58   : > { %2366 = vset.pattern.permute.xlu1 %v3747_v19 }
  0x59   : > { %858 = vperm.xlu1 %2366, %v2573_v2  }
  0x5b   : > { %672 = vperm.xlu0 %2415, %v2587_v6  }
  0x5d   : > { %2367 = vset.pattern.permute.xlu1 %v3759_v7 }
  0x5e   : > { %579 = vperm.xlu1 %2367, %v2607_v10  }
  0x5f   : > { %684 = vperm.xlu0 %2415, %v2633_v14  }
  0x62   : > { %2368 = vset.pattern.permute.xlu1 %v3753_v20 }
  0x63   : > { %687 = vperm.xlu0 %2415, %v2592_v8   ;;  %951 = vperm.xlu1 %2368, %v2576_v3  }
  0x67   : > { %702 = vperm.xlu0 %2415, %v2641_v15   ;;  %2369 = vset.pattern.permute.xlu1 %v3759_v7 }
  0x68   : > { %582 = vperm.xlu1 %2369, %v2650_v18  }
  0x6b   : > { %2420 = vset.pattern.permute.xlu0 %v3759_v7 }
  0x6c   : > { %570 = vperm.xlu0 %2420, %v2573_v2   ;;  %2370 = vset.pattern.permute.xlu1 %v3753_v20 }
  0x6d   : > { %954 = vperm.xlu1 %2370, %v2573_v2  }
  0x70   : > { %591 = vperm.xlu0 %2420, %v2592_v8  }
  0x71   : > { %2371 = vset.pattern.permute.xlu1 %v3751_v5 }
  0x72   : > { %489 = vperm.xlu1 %2371, %v2613_v11  }
  0x74   : > { %594 = vperm.xlu0 %2420, %v2597_v9  }
  0x76   : > { %2372 = vset.pattern.permute.xlu1 %v3755_v16 }
  0x77   : > { %675 = vperm.xlu1 %2372, %v2607_v10  }
  0x78   : > { %609 = vperm.xlu0 %2420, %v2647_v17  }
  0x7b   : > { %2373 = vset.pattern.permute.xlu1 %v3757_v22 }
  0x7c   : > { %612 = vperm.xlu0 %2420, %v2684_v21   ;;  %1047 = vperm.xlu1 %2373, %v2576_v3  }
  0x80   : > { %2425 = vset.pattern.permute.xlu0 %v3753_v20  ;;  %2374 = vset.pattern.permute.xlu1 %v3749_v1 }
  0x81   : > { %957 = vperm.xlu0 %2425, %v2581_v4   ;;  %396 = vperm.xlu1 %2374, %v2633_v14  }
  0x85   : > { %960 = vperm.xlu0 %2425, %v2587_v6   ;;  %2375 = vset.pattern.permute.xlu1 %v3755_v16 }
  0x86   : > { %678 = vperm.xlu1 %2375, %v2650_v18  }
  0x89   : > { %966 = vperm.xlu0 %2425, %v2650_v18  }
  0x8a   : > { %2376 = vset.pattern.permute.xlu1 %v3747_v19 }
  0x8b   : > { %864 = vperm.xlu1 %2376, %v2587_v6  }
  0x8d   : > { %975 = vperm.xlu0 %2425, %v2592_v8  }
  0x8f   : > { %2377 = vset.pattern.permute.xlu1 %v3759_v7 }
  0x90   : > { %585 = vperm.xlu1 %2377, %v2613_v11  }
  0x91   : > { %978 = vperm.xlu0 %2425, %v2597_v9  }
  0x93   : > { %v2703_v23 = vpop.permute.xlu1 %378  ;;  %v2705_v24 = vpop.permute.xlu0 %759 }
  0x94   : > { %2378 = vset.pattern.permute.xlu1 %v3745_v0 }
  0x95   : > { %984 = vperm.xlu0 %2425, %v2619_v12   ;;  %771 = vperm.xlu1 %2378, %v2607_v10  }
  0x97   : > { %v2716_v28 = vpop.permute.xlu0 %765 }
  0x98   : > { %v2718_v29 = vpop.permute.xlu1 %474 }
  0x99   : > { %987 = vperm.xlu0 %2425, %v2624_v13   ;;  %2379 = vset.pattern.permute.xlu1 %v3759_v7 }
  0x9a   : > { %588 = vperm.xlu1 %2379, %v2633_v14  }
  0x9b   : > { %v2729_v33 = vpop.permute.xlu0 %768 }
  0x9d   : > { %2432 = vset.pattern.permute.xlu0 %v3747_v19  ;;  %v2738_v36 = vpop.permute.xlu1 %567 }
  0x9e   : > { %855 = vperm.xlu0 %2432, %v2576_v3   ;;  %2380 = vset.pattern.permute.xlu1 %v3745_v0 }
  0x9f   : > { %774 = vperm.xlu1 %2380, %v2650_v18   ;;  %v2743_v38 = vpop.permute.xlu0 %783 }
  0xa2   : > { %861 = vperm.xlu0 %2432, %v2581_v4   ;;  %v2752_v42 = vpop.permute.xlu1 %381 }
  0xa3   : > { %2381 = vset.pattern.permute.xlu1 %v3749_v1  ;;  %v2755_v43 = vpop.permute.xlu0 %786 }
  0xa4   : > { %3763 = vst [vmem:[#allocation2_spill] sm:$0xff] %v2755_v43  ;;  %399 = vperm.xlu1 %2381, %v2592_v8   ;;  %v3761_v43 = vmov 8  }
  0xa6   : > { %876 = vperm.xlu0 %2432, %v2633_v14  }
  0xa7   : > { %v2765_v47 = vpop.permute.xlu1 %477 }
  0xa8   : > { %2382 = vset.pattern.permute.xlu1 %v3755_v16  ;;  %v2768_v48 = vpop.permute.xlu0 %375 }
  0xa9   : > { %681 = vperm.xlu1 %2382, %v2613_v11  }
  0xaa   : > { %879 = vperm.xlu0 %2432, %v2592_v8  }
  0xac   : > { %v2778_v52 = vpop.permute.xlu1 %384  ;;  %v2780_v53 = vpop.permute.xlu0 %387 }
  0xad   : > { %2383 = vset.pattern.permute.xlu1 %v3747_v19 }
  0xae   : > { %897 = vperm.xlu0 %2432, %v2647_v17   ;;  %867 = vperm.xlu1 %2383, %v2607_v10  }
  0xb0   : > { %v2791_v57 = vpop.permute.xlu0 %393 }
  0xb1   : > { %3764 = vst [vmem:[#allocation3_spill] sm:$0xff] %v2791_v57  ;;  %v2799_v60 = vpop.permute.xlu1 %480 }
  0xb2   : > { %2434 = vset.pattern.permute.xlu0 %v3757_v22  ;;  %2384 = vset.pattern.permute.xlu1 %v3749_v1 }
  0xb3   : > { %1050 = vperm.xlu0 %2434, %v2573_v2   ;;  %402 = vperm.xlu1 %2384, %v2597_v9  }
  0xb4   : > { %v2805_v62 = vpop.permute.xlu0 %408 }
  0xb5   : > { %3765 = vst [vmem:[#allocation4_spill] sm:$0xff] %v2805_v62 }
  0xb6   : > { %v2807_v63 = vpop.permute.xlu1 %573 }
  0xb7   : > { %1053 = vperm.xlu0 %2434, %v2581_v4   ;;  %2385 = vset.pattern.permute.xlu1 %v3751_v5  ;;  %v320_v4 = vld [vmem:[%s3739_s2] sm:$0xff] }
  0xb8   : > { %498 = vperm.xlu1 %2385, %v2597_v9   ;;  %v2812_v25 = vpop.permute.xlu0 %411  ;;  %v2827_v30 = vpack.c.bf16 %v321_v27, %v320_v4 }
  0xb9   : > { %3766 = vst [vmem:[#allocation5_spill] sm:$0xff] %v2812_v25 }
  0xba   : > { %v2814_v26 = vpop.permute.xlu1 %576  ;;  %2330 = vmatprep.subr.bf16.mxu1 %v2827_v30  ;;  %2307 = vmatprep.subr.bf16.mxu0 %v2827_v30 }
  0xbb   : > { %1068 = vperm.xlu0 %2434, %v2633_v14   ;;  %2332 = vmatpush3.bf16.msra.mxu1 %v2827_v30 }
  0xbc   : > { %2386 = vset.pattern.permute.xlu1 %v3747_v19 }
  0xbd   : > { %v2818_v2 = vpop.permute.xlu0 %471  ;;  %870 = vperm.xlu1 %2386, %v2650_v18  }
  0xbf   : > { %1071 = vperm.xlu0 %2434, %v2592_v8   ;;  %v2830_v31 = vpop.permute.xlu1 %762  ;;  %v323_v8 = vld [vmem:[%s3739_s2 + $0x18] sm:$0xff] }
  0xc0   : > { %v2848_v37 = vpack.c.bf16 %v323_v8, %v322_v34 }
  0xc1   : > { %2387 = vset.pattern.permute.xlu1 %v3757_v22  ;;  %v2835_v32 = vpop.permute.xlu0 %492 }
  0xc2   : > { %1056 = vperm.xlu1 %2387, %v2587_v6   ;;  %2331 = vmatprep.subr.bf16.mxu1 %v2848_v37 }
  0xc3   : > { %1077 = vperm.xlu0 %2434, %v2846_v35   ;;  %2333 = vmatpush3.bf16.msra.mxu1 %v2848_v37 }
  0xc4   : > { %v2851_v39 = vpop.permute.xlu1 %483 }
  0xc5   : > { %v2854_v40 = vpop.permute.xlu0 %495 }
  0xc6   : > { %2388 = vset.pattern.permute.xlu1 %v3745_v0  ;;  %2214 = vmatmul.mubr.msk.f32.vlgmr.msra.gmra.mrb[0].mxu1 %vm1415_vm0, %v307_v44 }
  0xc7   : > { %777 = vperm.xlu1 %2388, %v2613_v11   ;;  %1080 = vperm.xlu0 %2434, %v2619_v12  }
  0xc9   : > { %v2870_v45 = vpop.permute.xlu1 %669  ;;  %v2872_v46 = vpop.permute.xlu0 %510 }
  0xca   : > { %3767 = vst [vmem:[#allocation6_spill] sm:$0xff] %v2872_v46  ;;  %v3780_v46 = vmov 1  }
  0xcb   : > { %2389 = vset.pattern.permute.xlu1 %v3753_v20  ;;  %1086 = vperm.xlu0 %2434, %v2641_v15   ;;  %v308_v20 = vld [vmem:[%s2861_s10 + $0x20] sm:$0xff] }
  0xcc   : > { %963 = vperm.xlu1 %2389, %v2607_v10   ;;  %2216 = vmatprep.mubr.msk.f32.mxu1 %vm1415_vm0, %v308_v20 }
  0xcd   : > { %v2877_v49 = vpop.permute.xlu0 %513 }
  0xce   : > { %3768 = vst [vmem:[#allocation7_spill] sm:$0xff] %v2877_v49  ;;  %v2879_v50 = vpop.permute.xlu1 %390  ;;  %v3776_v49 = vmov 6  }
  0xcf   : > { %3769 = vst [vmem:[#allocation8_spill] sm:$0xff] %v2879_v50  ;;  %1089 = vperm.xlu0 %2434, %v2647_v17   ;;  %v3786_v50 = vmov 0  }
  0xd0   : > { %2390 = vset.pattern.permute.xlu1 %v3745_v0 }
  0xd1   : > { %780 = vperm.xlu1 %2390, %v2633_v14  }
  0xd2   : > { %v2884_v51 = vpop.permute.xlu0 %663 }
  0xd3   : > { %v2886_v54 = vpop.permute.xlu1 %486  ;;  %2439 = vset.pattern.permute.xlu0 %v3761_v43  ;;  %v343_v43 = vcvt.s32.f32 %v2587_v6  ;;  %v2513_v6 = vmov 0.0  }
  0xd5   : > { %2391 = vset.pattern.permute.xlu1 %v3749_v1  ;;  %v359_v57 = vmax.f32 %v343_v43, 1.0 }
  0xd6   : > { %v2889_v55 = vpop.permute.xlu0 %666  ;;  %405 = vperm.xlu1 %2391, %v2846_v35  }
  0xd8   : > { %v2892_v56 = vpop.permute.xlu1 %858 }
  0xda   : > { %v2894_v58 = vpop.permute.xlu0 %672  ;;  %2392 = vset.pattern.permute.xlu1 %v3751_v5 }
  0xdb   : > { %501 = vperm.xlu1 %2392, %v2846_v35  }
  0xdd   : > { %v2898_v59 = vpop.permute.xlu1 %579 }
  0xde   : > { %v2900_v61 = vpop.permute.xlu0 %684 }
  0xdf   : > { %2393 = vset.pattern.permute.xlu1 %v3747_v19 }
  0xe0   : > { %873 = vperm.xlu1 %2393, %v2613_v11  }
  0xe2   : > { %v2904_v4 = vpop.permute.xlu1 %951  ;;  %v2906_v27 = vpop.permute.xlu0 %687 }
  0xe4   : > { %2394 = vset.pattern.permute.xlu1 %v3757_v22 }
  0xe5   : > { %1059 = vperm.xlu1 %2394, %v2607_v10  }
  0xe6   : > { %v2910_v34 = vpop.permute.xlu0 %702 }
  0xe7   : > { %3770 = vst [vmem:[#allocation9_spill] sm:$0xff] %v2910_v34  ;;  %v2912_v8 = vpop.permute.xlu1 %582  ;;  %v340_v34 = vcvt.s32.f32 %v2576_v3  ;;  %v372_v3 = vlaneseq }
  0xe8   : > { %3771 = vst [vmem:[#allocation10_spill] sm:$0xff] %v2912_v8  ;;  %v3783_v8 = vmov 3  }
  0xe9   : > { %2395 = vset.pattern.permute.xlu1 %v3751_v5 }
  0xea   : > { %504 = vperm.xlu1 %2395, %v2619_v12  }
  0xeb   : > { %v2916_v41 = vpop.permute.xlu0 %570 }
  0xec   : > { %v2918_v44 = vpop.permute.xlu1 %954 }
  0xee   : > { %2396 = vset.pattern.permute.xlu1 %v3755_v16  ;;  %v309_v16 = vld [vmem:[%s2861_s10 + $0x28] sm:$0xff] }
  0xef   : > { %690 = vperm.xlu1 %2396, %v2597_v9   ;;  %v2922_v0 = vpop.permute.xlu0 %591  ;;  %2217 = vmatmul.mubr.msk.f32.gmra.mrb[2].mxu1 %vm1415_vm0, %v309_v16  ;;  %v3777_v16 = vmov 2  }
  0xf1   : > { %v2924_v10 = vpop.permute.xlu1 %489 }
  0xf2   : > { %3772 = vst [vmem:[#allocation11_spill] sm:$0xff] %v2924_v10 }
  0xf3   : > { %2397 = vset.pattern.permute.xlu1 %v3757_v22  ;;  %v2927_v19 = vpop.permute.xlu0 %594 }
  0xf4   : > { %3773 = vst [vmem:[#allocation12_spill] sm:$0xff] %v2927_v19  ;;  %1062 = vperm.xlu1 %2397, %v2650_v18  }
  0xf6   : > { %v2930_v1 = vpop.permute.xlu1 %675 }
  0xf7   : > { %v2932_v5 = vpop.permute.xlu0 %609 }
  0xf8   : > { %3774 = vst [vmem:[#allocation13_spill] sm:$0xff] %v2932_v5  ;;  %2398 = vset.pattern.permute.xlu1 %v3759_v7  ;;  %v356_v5 = vmax.f32 %v340_v34, 1.0 }
  0xf9   : > { %597 = vperm.xlu1 %2398, %v2846_v35  }
  0xfa   : > { %1305 = vperm.xlu0 %2439, %v356_v5   ;;  %v2965_v5 = vand.u32 127, %v372_v3 }
  0xfb   : > { %v2940_v62 = vpop.permute.xlu1 %1047  ;;  %v2942_v22 = vpop.permute.xlu0 %612 }
  0xfc   : > { %3775 = vst [vmem:[#allocation14_spill] sm:$0xff] %v2942_v22  ;;  %vm422_vm1 = vcmp.eq.s32.totalorder %v2965_v5, %v2768_v48  ;;  %vm518_vm2 = vcmp.eq.s32.totalorder %v2965_v5, %v2818_v2  ;;  %vm614_vm3 = vcmp.eq.s32.totalorder %v2965_v5, %v2738_v36  ;;  %vm710_vm4 = vcmp.eq.s32.totalorder %v2965_v5, %v2884_v51 }
  0xfd   : > { %2399 = vset.pattern.permute.xlu1 %v3776_v49  ;;  %v438_v3 = vsel %vm422_vm1, 1.0, %v2513_v6  ;;  %v3785_v2 = vmov 7   ;;  %vm806_vm5 = vcmp.eq.s32.totalorder %v2965_v5, %v2705_v24  ;;  %vm519_vm6 = vcmp.eq.s32.totalorder %v2965_v5, %v2718_v29 }
  0xfe   : > { %969 = vperm.xlu1 %2399, %v2613_v11   ;;  %1320 = vperm.xlu0 %2439, %v359_v57   ;;  %vm423_vm7 = vcmp.eq.s32.totalorder %v2965_v5, %v2703_v23  ;;  %vm615_vm8 = vcmp.eq.s32.totalorder %v2965_v5, %v2916_v41  ;;  %vm998_vm9 = vcmp.eq.s32.totalorder %v2965_v5, %v2904_v4 }
  0xff   : > { %v439_v23 = vsel %vm423_vm7, 1.0, %v2513_v6  ;;  %vm526_vm11 = vcmp.eq.s32.totalorder %v2965_v5, %v2854_v40  ;;  %vm1094_vm12 = vcmp.eq.s32.totalorder %v2965_v5, %v2940_v62  ;;  %vm711_vm13 = vcmp.eq.s32.totalorder %v2965_v5, %v2889_v55 }
 0x100   : > { %v2947_v7 = vpop.permute.xlu1 %396  ;;  %v2949_v25 = vpop.permute.xlu0 %957  ;;  %vm622_vm14 = vcmp.eq.s32.totalorder %v2965_v5, %v2922_v0  ;;  %vm520_vm15 = vcmp.eq.s32.totalorder %v2965_v5, %v2765_v47  ;;  %v542_v62 = vsel %vm526_vm11, 1.0, %v2513_v6  ;;  %v727_v55 = vsel %vm711_vm13, 1.0, %v2513_v6 }
 0x101   : > { %vm718_vm1 = vcmp.eq.s32.totalorder %v2965_v5, %v2906_v27  ;;  %v638_v0 = vsel %vm622_vm14, 1.0, %v2513_v6  ;;  %vm712_vm7 = vcmp.eq.s32.totalorder %v2965_v5, %v2870_v45  ;;  %vm903_vm11 = vcmp.eq.s32.totalorder %v2965_v5, %v2892_v56 }
 0x102   : > { %2400 = vset.pattern.permute.xlu1 %v3777_v16  ;;  %v728_v27 = vsel %vm712_vm7, 1.0, %v2513_v6  ;;  %vm521_vm13 = vcmp.eq.s32.totalorder %v2965_v5, %v2799_v60  ;;  %vm425_vm14 = vcmp.eq.s32.totalorder %v2965_v5, %v2778_v52 }
 0x103   : > { %600 = vperm.xlu1 %2400, %v2619_v12  }
 0x104   : > { %v2954_v20 = vpop.permute.xlu0 %960 }
 0x105   : > { %v2956_v22 = vpop.permute.xlu1 %678 }
 0x106   : > { %3778 = vst [vmem:[#allocation15_spill] sm:$0xff] %v2956_v22  ;;  %v534_v22 = vsel %vm518_vm2, 1.0, %v2513_v6 }
 0x107   : > { %2402 = vset.pattern.permute.xlu1 %v3776_v49  ;;  %v550_v43 = vadd.f32 %v534_v22, %v438_v3 }
 0x108   : > { %972 = vperm.xlu1 %2402, %v2633_v14   ;;  %v2960_v34 = vpop.permute.xlu0 %966 }
 0x109   : > { %3779 = vst [vmem:[#allocation16_spill] sm:$0xff] %v2960_v34 }
 0x10a   : > { %v2962_v19 = vpop.permute.xlu1 %864 }
 0x10b   : > { %vm905_vm7 = vcmp.eq.s32.totalorder %v2965_v5, %v2962_v19 }
 0x10c   : > { %2404 = vset.pattern.permute.xlu1 %v3780_v46  ;;  %v2968_v10 = vpop.permute.xlu0 %975 }
 0x10d   : > { %507 = vperm.xlu1 %2404, %v2624_v13  }
 0x10f   : > { %v2975_v34 = vpop.permute.xlu1 %585 }
 0x110   : > { %3781 = vst [vmem:[#allocation17_spill] sm:$0xff] %v2975_v34  ;;  %v2977_v49 = vpop.permute.xlu0 %978  ;;  %v726_v34 = vsel %vm710_vm4, 1.0, %v2513_v6  ;;  %vm616_vm4 = vcmp.eq.s32.totalorder %v2965_v5, %v2807_v63 }
 0x111   : > { %3782 = vst [vmem:[#allocation18_spill] sm:$0xff] %v2977_v49  ;;  %2405 = vset.pattern.permute.xlu1 %v3783_v8  ;;  %v630_v49 = vsel %vm614_vm3, 1.0, %v2513_v6  ;;  %vm424_vm3 = vcmp.eq.s32.totalorder %v2965_v5, %v2752_v42  ;;  %v632_v47 = vsel %vm616_vm4, 1.0, %v2513_v6 }
 0x112   : > { %693 = vperm.xlu1 %2405, %v2846_v35   ;;  %v646_v22 = vadd.f32 %v630_v49, %v550_v43  ;;  %v311_v49 = vld [vmem:[%s2861_s10 + $0x38] sm:$0xff] }
 0x114   : > { %v2987_v48 = vpop.permute.xlu1 %771  ;;  %v2989_v57 = vpop.permute.xlu0 %984  ;;  %v742_v3 = vadd.f32 %v726_v34, %v646_v22  ;;  %v535_v34 = vsel %vm519_vm6, 1.0, %v2513_v6  ;;  %v631_v22 = vsel %vm615_vm8, 1.0, %v2513_v6  ;;  %vm807_vm6 = vcmp.eq.s32.totalorder %v2965_v5, %v2830_v31 }
 0x115   : > { %3784 = vst [vmem:[#allocation19_spill] sm:$0xff] %v2989_v57  ;;  %v822_v57 = vsel %vm806_vm5, 1.0, %v2513_v6  ;;  %vm814_vm5 = vcmp.eq.s32.totalorder %v2965_v5, %v2743_v38  ;;  %v734_v38 = vsel %vm718_vm1, 1.0, %v2513_v6  ;;  %vm808_vm8 = vcmp.eq.s32.totalorder %v2965_v5, %v2716_v28 }
 0x116   : > { %2406 = vset.pattern.permute.xlu1 %v3785_v2  ;;  %v838_v29 = vadd.f32 %v822_v57, %v742_v3  ;;  %v551_v57 = vadd.f32 %v535_v34, %v439_v23  ;;  %v1014_v3 = vsel %vm998_vm9, 1.0, %v2513_v6  ;;  %v1110_v34 = vsel %vm1094_vm12, 1.0, %v2513_v6 }
 0x117   : > { %1065 = vperm.xlu1 %2406, %v2613_v11   ;;  %v310_v11 = vld [vmem:[%s2861_s10 + $0x30] sm:$0xff]  ;;  %v830_v31 = vsel %vm814_vm5, 1.0, %v2513_v6  ;;  %v823_v45 = vsel %vm807_vm6, 1.0, %v2513_v6  ;;  %vm1006_vm9 = vcmp.eq.s32.totalorder %v2965_v5, %v2968_v10  ;;  %v824_v56 = vsel %vm808_vm8, 1.0, %v2513_v6 }
 0x118   : > { %v2997_v36 = vpop.permute.xlu0 %987  ;;  %2219 = vmatprep.mubr.msk.f32.mxu1 %vm1415_vm0, %v310_v11  ;;  %vm617_vm1 = vcmp.eq.s32.totalorder %v2965_v5, %v2814_v26  ;;  %vm809_vm5 = vcmp.eq.s32.totalorder %v2965_v5, %v2729_v33  ;;  %v921_v33 = vsel %vm905_vm7, 1.0, %v2513_v6  ;;  %vm1001_vm8 = vcmp.eq.s32.totalorder %v2965_v5, %v2954_v20 }
 0x119   : > { %v2999_v51 = vpop.permute.xlu1 %588  ;;  %2220 = vmatmul.mubr.msk.f32.gmra.mrb[4].mxu1 %vm1415_vm0, %v311_v49 }
 0x11b   : > { %2407 = vset.pattern.permute.xlu1 %v3786_v50 }
 0x11c   : > { %414 = vperm.xlu1 %2407, %v2641_v15  }
 0x11d   : > { %v856_v24 = vpop.permute.xlu0 %855 }
 0x11e   : > { %vm902_vm10 = vcmp.eq.s32.totalorder %v2965_v5, %v856_v24  ;;  %v3017_v43 = vpop.permute.xlu1 %774  ;;  %v647_v24 = vadd.f32 %v631_v22, %v551_v57  ;;  %v440_v57 = vsel %vm424_vm3, 1.0, %v2513_v6  ;;  %vm713_vm3 = vcmp.eq.s32.totalorder %v2965_v5, %v2894_v58 }
 0x11f   : > { %v918_v41 = vsel %vm902_vm10, 1.0, %v2513_v6  ;;  %v729_v58 = vsel %vm713_vm3, 1.0, %v2513_v6  ;;  %vm618_vm3 = vcmp.eq.s32.totalorder %v2965_v5, %v2898_v59 }
 0x120   : > { %v934_v4 = vadd.f32 %v918_v41, %v838_v29  ;;  %2408 = vset.pattern.permute.xlu1 %v3783_v8  ;;  %v3787_v41 = vmov 5   ;;  %v743_v63 = vadd.f32 %v727_v55, %v647_v24 }
 0x121   : > { %v3031_v11 = vpop.permute.xlu0 %861  ;;  %696 = vperm.xlu1 %2408, %v2619_v12  }
 0x122   : > { %v1030_v40 = vadd.f32 %v1014_v3, %v934_v4  ;;  %v536_v4 = vsel %vm520_vm15, 1.0, %v2513_v6  ;;  %v839_v55 = vadd.f32 %v823_v45, %v743_v63  ;;  %vm904_vm12 = vcmp.eq.s32.totalorder %v2965_v5, %v3031_v11 }
 0x123   : > { %v400_v49 = vpop.permute.xlu1 %399  ;;  %vm999_vm15 = vcmp.eq.s32.totalorder %v2965_v5, %v2918_v44  ;;  %v3788_v11 = vmov 4   ;;  %v920_v28 = vsel %vm904_vm12, 1.0, %v2513_v6  ;;  %vm621_vm12 = vcmp.eq.s32.totalorder %v2965_v5, %v2999_v51 }
 0x124   : > { %vm430_vm2 = vcmp.eq.s32.totalorder %v2965_v5, %v400_v49  ;;  %v1126_v29 = vadd.f32 %v1110_v34, %v1030_v40  ;;  %v1015_v44 = vsel %vm999_vm15, 1.0, %v2513_v6 }
 0x125   : > { %v446_v23 = vsel %vm430_vm2, 1.0, %v2513_v6  ;;  %2409 = vset.pattern.permute.xlu1 %v3787_v41  ;;  %v3051_v22 = vpop.permute.xlu0 %876  ;;  %vm1000_vm2 = vcmp.eq.s32.totalorder %v2965_v5, %v2949_v25 }
 0x126   : > { %v558_v42 = vadd.f32 %v542_v62, %v446_v23  ;;  %882 = vperm.xlu1 %2409, %v2597_v9   ;;  %2178 = vmatprep.mubr.f32.mxu0 %v1126_v29  ;;  %v552_v62 = vadd.f32 %v536_v4, %v440_v57  ;;  %v1022_v4 = vsel %vm1006_vm9, 1.0, %v2513_v6  ;;  %v1016_v25 = vsel %vm1000_vm2, 1.0, %v2513_v6 }
 0x127   : > { %vm522_vm2 = vcmp.eq.s32.totalorder %v2965_v5, %v2851_v39 }
 0x128   : > { %v654_v3 = vadd.f32 %v638_v0, %v558_v42  ;;  %v3070_v40 = vpop.permute.xlu1 %681  ;;  %v648_v34 = vadd.f32 %v632_v47, %v552_v62  ;;  %v537_v47 = vsel %vm521_vm13, 1.0, %v2513_v6  ;;  %v633_v62 = vsel %vm617_vm1, 1.0, %v2513_v6 }
 0x129   : > { %v880_v49 = vpop.permute.xlu0 %879  ;;  %vm717_vm13 = vcmp.eq.s32.totalorder %v2965_v5, %v2900_v61  ;;  %vm426_vm1 = vcmp.eq.s32.totalorder %v2965_v5, %v2780_v53  ;;  %v634_v53 = vsel %vm618_vm3, 1.0, %v2513_v6 }
 0x12a   : > { %v750_v24 = vadd.f32 %v734_v38, %v654_v3  ;;  %vm910_vm10 = vcmp.eq.s32.totalorder %v2965_v5, %v880_v49  ;;  %2410 = vset.pattern.permute.xlu1 %v3777_v16  ;;  %v744_v23 = vadd.f32 %v728_v27, %v648_v34  ;;  %v919_v38 = vsel %vm903_vm11, 1.0, %v2513_v6 }
 0x12b   : > { %v926_v29 = vsel %vm910_vm10, 1.0, %v2513_v6  ;;  %603 = vperm.xlu1 %2410, %v2624_v13   ;;  %v935_v57 = vadd.f32 %v919_v38, %v839_v55  ;;  %v441_v3 = vsel %vm425_vm14, 1.0, %v2513_v6  ;;  %vm525_vm10 = vcmp.eq.s32.totalorder %v2965_v5, %v2835_v32 }
 0x12c   : > { %v846_v0 = vadd.f32 %v830_v31, %v750_v24  ;;  %v840_v52 = vadd.f32 %v824_v56, %v744_v23  ;;  %v553_v27 = vadd.f32 %v537_v47, %v441_v3  ;;  %v825_v56 = vsel %vm809_vm5, 1.0, %v2513_v6 }
 0x12d   : > { %v3088_v10 = vpop.permute.xlu1 %867  ;;  %v3090_v42 = vpop.permute.xlu0 %897  ;;  %v1031_v45 = vadd.f32 %v1015_v44, %v935_v57  ;;  %vm429_vm11 = vcmp.eq.s32.totalorder %v2965_v5, %v2947_v7  ;;  %v733_v51 = vsel %vm717_vm13, 1.0, %v2513_v6  ;;  %vm909_vm14 = vcmp.eq.s32.totalorder %v2965_v5, %v3051_v22 }
 0x12e   : > { %v942_v63 = vadd.f32 %v926_v29, %v846_v0  ;;  %v936_v49 = vadd.f32 %v920_v28, %v840_v52  ;;  %v649_v55 = vadd.f32 %v633_v62, %v553_v27  ;;  %v1017_v28 = vsel %vm1001_vm8, 1.0, %v2513_v6 }
 0x12f   : > { %2411 = vset.pattern.permute.xlu1 %v3788_v11  ;;  %v445_v44 = vsel %vm429_vm11, 1.0, %v2513_v6  ;;  %v925_v27 = vsel %vm909_vm14, 1.0, %v2513_v6  ;;  %vm810_vm5 = vcmp.eq.s32.totalorder %v2965_v5, %v2987_v48  ;;  %vm523_vm8 = vcmp.eq.s32.totalorder %v2965_v5, %v2886_v54 }
 0x130   : > { %789 = vperm.xlu1 %2411, %v2846_v35   ;;  %v3108_v60 = vadd.f32 %v1022_v4, %v942_v63  ;;  %v1032_v0 = vadd.f32 %v1016_v25, %v936_v49  ;;  %v745_v4 = vadd.f32 %v729_v58, %v649_v55  ;;  %v539_v54 = vsel %vm523_vm8, 1.0, %v2513_v6 }
 0x131   : > { %vm811_vm13 = vcmp.eq.s32.totalorder %v2965_v5, %v3017_v43 }
 0x132   : > { %v1051_v26 = vpop.permute.xlu0 %1050  ;;  %v3117_v31 = vpop.permute.xlu1 %402  ;;  %v841_v63 = vadd.f32 %v825_v56, %v745_v4  ;;  %v347_v4 = vcvt.s32.f32 %v2633_v14 }
 0x133   : > { %vm1095_vm4 = vcmp.eq.s32.totalorder %v2965_v5, %v1051_v26  ;;  %v637_v26 = vsel %vm621_vm12, 1.0, %v2513_v6 }
 0x134   : > { %v1111_v24 = vsel %vm1095_vm4, 1.0, %v2513_v6  ;;  %2412 = vset.pattern.permute.xlu1 %v3777_v16  ;;  %v937_v57 = vadd.f32 %v921_v33, %v841_v63  ;;  %vm714_vm4 = vcmp.eq.s32.totalorder %v2965_v5, %v2930_v1  ;;  %v826_v1 = vsel %vm810_vm5, 1.0, %v2513_v6  ;;  %v3790_v33 = vld [vmem:[#allocation10_spill] sm:$0xff] }
 0x135   : > { %v1127_v34 = vadd.f32 %v1111_v24, %v1031_v45  ;;  %606 = vperm.xlu1 %2412, %v2641_v15   ;;  %v538_v24 = vsel %vm522_vm2, 1.0, %v2513_v6  ;;  %v730_v59 = vsel %vm714_vm4, 1.0, %v2513_v6  ;;  %v363_v56 = vmax.f32 %v347_v4, 1.0 }
 0x136   : > { %v1054_v29 = vpop.permute.xlu0 %1053  ;;  %v1033_v3 = vadd.f32 %v1017_v28, %v937_v57  ;;  %v3792_v57 = vmov 6   ;;  %vm716_vm5 = vcmp.eq.s32.totalorder %v2965_v5, %v3070_v40 }
 0x137   : > { %vm1096_vm6 = vcmp.eq.s32.totalorder %v2965_v5, %v1054_v29  ;;  %2179 = vmatmul.mubr.f32.vlgmr.msra.gmra.mrb[0].mxu0 %v1127_v34  ;;  %v3129_v23 = vpop.permute.xlu1 %498 }
 0x138   : > { %v1112_v16 = vsel %vm1096_vm6, 1.0, %v2513_v6  ;;  %2309 = vmatpush3.bf16.msra.mxu0 %v2827_v30  ;;  %v345_v30 = vcvt.s32.f32 %v2650_v18  ;;  %v541_v18 = vsel %vm525_vm10, 1.0, %v2513_v6  ;;  %vm906_vm6 = vcmp.eq.s32.totalorder %v2965_v5, %v3088_v10  ;;  %v313_v10 = vld [vmem:[%s2861_s10 + $0x48] sm:$0xff] }
 0x139   : > { %v1128_v38 = vadd.f32 %v1112_v16, %v1032_v0  ;;  %2413 = vset.pattern.permute.xlu1 %v3788_v11  ;;  %2311 = vmatprep.subr.bf16.mxu0 %v2848_v37  ;;  %v557_v7 = vadd.f32 %v541_v18, %v445_v44  ;;  %v922_v48 = vsel %vm906_vm6, 1.0, %v2513_v6  ;;  %v312_v0 = vld [vmem:[%s2861_s10 + $0x40] sm:$0xff]  ;;  %vm619_vm10 = vcmp.eq.s32.totalorder %v2965_v5, %v3790_v33 }
 0x13a   : > { %792 = vperm.xlu1 %2413, %v2619_v12   ;;  %v361_v47 = vmax.f32 %v345_v30, 1.0  ;;  %2222 = vmatprep.mubr.msk.f32.mxu1 %vm1415_vm0, %v312_v0  ;;  %v827_v44 = vsel %vm811_vm13, 1.0, %v2513_v6  ;;  %v1069_v4 = vpop.permute.xlu0 %1068 }
 0x13b   : > { %2181 = vmatprep.mubr.f32.mxu0 %v1128_v38  ;;  %v653_v62 = vadd.f32 %v637_v26, %v557_v7  ;;  %2223 = vmatmul.mubr.msk.f32.gmra.mrb[6].mxu1 %vm1415_vm0, %v313_v10  ;;  %v3789_v38 = vld [vmem:[#allocation8_spill] sm:$0xff] }
 0x13c   : > { %v3142_v19 = vpop.permute.xlu1 %870  ;;  %2313 = vmatpush3.bf16.msra.mxu0 %v2848_v37  ;;  %1330 = vperm.xlu0 %2439, %v361_v47   ;;  %v635_v47 = vsel %vm619_vm10, 1.0, %v2513_v6  ;;  %v3793_v7 = vld [vmem:[#allocation16_spill] sm:$0xff]  ;;  %vm1101_vm10 = vcmp.eq.s32.totalorder %v2965_v5, %v1069_v4 }
 0x13d   : > { %v749_v49 = vadd.f32 %v733_v51, %v653_v62  ;;  %vm907_vm14 = vcmp.eq.s32.totalorder %v2965_v5, %v3142_v19  ;;  %v314_v51 = vld [vmem:[%s2861_s10 + $0x50] sm:$0xff]  ;;  %v315_v19 = vld [vmem:[%s2861_s10 + $0x58] sm:$0xff] }
 0x13e   : > { %2414 = vset.pattern.permute.xlu1 %v3786_v50  ;;  %v923_v43 = vsel %vm907_vm14, 1.0, %v2513_v6  ;;  %2225 = vmatprep.mubr.msk.f32.mxu1 %vm1415_vm0, %v314_v51  ;;  %vm431_vm14 = vcmp.eq.s32.totalorder %v2965_v5, %v3117_v31 }
 0x13f   : > { %417 = vperm.xlu1 %2414, %v2647_v17   ;;  %2226 = vmatmul.mubr.msk.f32.gmra.mrb[8].mxu1 %vm1415_vm0, %v315_v19 }
 0x140   : > { %1340 = vperm.xlu0 %2439, %v363_v56  }
 0x141   : > { %v1057_v52 = vpop.permute.xlu1 %1056 }
 0x142   : > { %vm1097_vm9 = vcmp.eq.s32.totalorder %v2965_v5, %v1057_v52 }
 0x143   : > { %v1113_v20 = vsel %vm1097_vm9, 1.0, %v2513_v6  ;;  %2416 = vset.pattern.permute.xlu1 %v3783_v8  ;;  %vm427_vm9 = vcmp.eq.s32.totalorder %v2965_v5, %v3789_v38 }
 0x144   : > { %v1129_v37 = vadd.f32 %v1113_v20, %v1033_v3  ;;  %699 = vperm.xlu1 %2416, %v2624_v13   ;;  %v443_v28 = vsel %vm427_vm9, 1.0, %v2513_v6 }
 0x145   : > { %v555_v3 = vadd.f32 %v539_v54, %v443_v28  ;;  %v1117_v28 = vsel %vm1101_vm10, 1.0, %v2513_v6 }
 0x146   : > { %2182 = vmatmul.mubr.f32.gmra.mrb[2].mxu0 %v1129_v37  ;;  %v3157_v17 = vpop.permute.xlu1 %777 }
 0x147   : > { %v651_v18 = vadd.f32 %v635_v47, %v555_v3  ;;  %vm812_vm6 = vcmp.eq.s32.totalorder %v2965_v5, %v3157_v17  ;;  %v1072_v17 = vpop.permute.xlu0 %1071 }
 0x148   : > { %2417 = vset.pattern.permute.xlu1 %v3787_v41  ;;  %v828_v40 = vsel %vm812_vm6, 1.0, %v2513_v6 }
 0x149   : > { %885 = vperm.xlu1 %2417, %v2846_v35  }
 0x14b   : > { %v964_v32 = vpop.permute.xlu1 %963 }
 0x14c   : > { %vm1002_vm7 = vcmp.eq.s32.totalorder %v2965_v5, %v964_v32 }
 0x14d   : > { %2418 = vset.pattern.permute.xlu1 %v3786_v50 }
 0x14e   : > { %420 = vperm.xlu1 %2418, %v2684_v21  }
 0x150   : > { %v781_v45 = vpop.permute.xlu1 %780 }
 0x151   : > { %vm813_vm15 = vcmp.eq.s32.totalorder %v2965_v5, %v781_v45 }
 0x152   : > { %v829_v61 = vsel %vm813_vm15, 1.0, %v2513_v6  ;;  %2419 = vset.pattern.permute.xlu1 %v3780_v46  ;;  %v442_v46 = vsel %vm426_vm1, 1.0, %v2513_v6  ;;  %vm1003_vm15 = vcmp.eq.s32.totalorder %v2965_v5, %v3793_v7 }
 0x153   : > { %v845_v25 = vadd.f32 %v829_v61, %v749_v49  ;;  %516 = vperm.xlu1 %2419, %v2684_v21   ;;  %v554_v58 = vadd.f32 %v538_v24, %v442_v46  ;;  %v3254_v49 = vld [vmem:[%s2570_s30 + $0x70] sm:$0xff]  ;;  %v3261_v24 = vld [vmem:[%s2570_s30 + $0x60] sm:$0xff] }
 0x155   : > { %v3182_v50 = vpop.permute.xlu1 %405  ;;  %v3184_v22 = vadd.f32 %v925_v27, %v845_v25  ;;  %v650_v34 = vadd.f32 %v634_v53, %v554_v58 }
 0x157   : > { %2421 = vset.pattern.permute.xlu1 %v3787_v41 }
 0x158   : > { %888 = vperm.xlu1 %2421, %v2619_v12   ;;  %v746_v12 = vadd.f32 %v730_v59, %v650_v34  ;;  %v3270_v59 = vld [vmem:[%s2570_s30 + $0x68] sm:$0xff] }
 0x15a   : > { %v3195_v39 = vpop.permute.xlu1 %501  ;;  %v842_v29 = vadd.f32 %v826_v1, %v746_v12  ;;  %v3794_v1 = vld [vmem:[#allocation3_spill] sm:$0xff] }
 0x15b   : > { %vm428_vm2 = vcmp.eq.s32.totalorder %v2965_v5, %v3794_v1  ;;  %v3795_v12 = vld [vmem:[#allocation11_spill] sm:$0xff] }
 0x15c   : > { %2422 = vset.pattern.permute.xlu1 %v3785_v2  ;;  %v938_v16 = vadd.f32 %v922_v48, %v842_v29  ;;  %vm524_vm3 = vcmp.eq.s32.totalorder %v2965_v5, %v3795_v12  ;;  %v3796_v48 = vld [vmem:[#allocation17_spill] sm:$0xff]  ;;  %v444_v29 = vsel %vm428_vm2, 1.0, %v2513_v6  ;;  %v3800_v12 = vld [vmem:[#allocation18_spill] sm:$0xff] }
 0x15d   : > { %1074 = vperm.xlu1 %2422, %v2597_v9   ;;  %v1018_v9 = vsel %vm1002_vm7, 1.0, %v2513_v6  ;;  %vm620_vm4 = vcmp.eq.s32.totalorder %v2965_v5, %v3796_v48  ;;  %v540_v0 = vsel %vm524_vm3, 1.0, %v2513_v6 }
 0x15e   : > { %v1034_v63 = vadd.f32 %v1018_v9, %v938_v16  ;;  %v556_v10 = vadd.f32 %v540_v0, %v444_v29  ;;  %v3801_v29 = vld [vmem:[#allocation5_spill] sm:$0xff] }
 0x15f   : > { %v3206_v55 = vpop.permute.xlu1 %873 }
 0x160   : > { %vm908_vm7 = vcmp.eq.s32.totalorder %v2965_v5, %v3206_v55 }
 0x161   : > { %2423 = vset.pattern.permute.xlu1 %v3788_v11  ;;  %v924_v33 = vsel %vm908_vm7, 1.0, %v2513_v6  ;;  %vm434_vm7 = vcmp.eq.s32.totalorder %v2965_v5, %v3801_v29  ;;  %v3805_v29 = vld [vmem:[#allocation13_spill] sm:$0xff] }
 0x162   : > { %795 = vperm.xlu1 %2423, %v2624_v13   ;;  %v3791_v13 = vld [vmem:[#allocation15_spill] sm:$0xff] }
 0x163   : > { %vm715_vm12 = vcmp.eq.s32.totalorder %v2965_v5, %v3791_v13 }
 0x164   : > { %v1060_v14 = vpop.permute.xlu1 %1059  ;;  %v731_v20 = vsel %vm715_vm12, 1.0, %v2513_v6  ;;  %vm527_vm12 = vcmp.eq.s32.totalorder %v2965_v5, %v3129_v23  ;;  %v316_v23 = vld [vmem:[%s2861_s10 + $0x60] sm:$0xff] }
 0x165   : > { %vm1098_vm11 = vcmp.eq.s32.totalorder %v2965_v5, %v1060_v14  ;;  %v747_v26 = vadd.f32 %v731_v20, %v651_v18  ;;  %v3321_v20 = vld [vmem:[%s2570_s30 + $0x78] sm:$0xff]  ;;  %2228 = vmatprep.mubr.msk.f32.mxu1 %vm1415_vm0, %v316_v23 }
 0x166   : > { %v1114_v30 = vsel %vm1098_vm11, 1.0, %v2513_v6  ;;  %2424 = vset.pattern.permute.xlu1 %v3792_v57  ;;  %vm1102_vm11 = vcmp.eq.s32.totalorder %v2965_v5, %v1072_v17 }
 0x167   : > { %v1130_v52 = vadd.f32 %v1114_v30, %v1034_v63  ;;  %981 = vperm.xlu1 %2424, %v2846_v35   ;;  %v843_v32 = vadd.f32 %v827_v44, %v747_v26  ;;  %v317_v44 = vld [vmem:[%s2861_s10 + $0x68] sm:$0xff]  ;;  %v3797_v26 = vld [vmem:[#allocation6_spill] sm:$0xff] }
 0x168   : > { %2229 = vmatmul.mubr.msk.f32.gmra.mrb[10].mxu1 %vm1415_vm0, %v317_v44  ;;  %v2481_v44 = vld [vmem:[%s2570_s30 + $0x30] sm:$0xff] }
 0x169   : > { %2184 = vmatprep.mubr.f32.mxu0 %v1130_v52  ;;  %v3235_v37 = vpop.permute.xlu1 %504  ;;  %v939_v45 = vadd.f32 %v923_v43, %v843_v32  ;;  %v1118_v52 = vsel %vm1102_vm11, 1.0, %v2513_v6  ;;  %v447_v43 = vsel %vm431_vm14, 1.0, %v2513_v6 }
 0x16a   : > { %v1134_v7 = vadd.f32 %v1118_v52, %v3108_v60  ;;  %v3379_v52 = vld [vmem:[%s2861_s10 + $0x78] sm:$0xff] }
 0x16b   : > { %2426 = vset.pattern.permute.xlu1 %v3788_v11 }
 0x16c   : > { %798 = vperm.xlu1 %2426, %v2641_v15   ;;  %v1019_v15 = vsel %vm1003_vm15, 1.0, %v2513_v6  ;;  %vm531_vm15 = vcmp.eq.s32.totalorder %v2965_v5, %v3797_v26  ;;  %v346_v26 = vcvt.s32.f32 %v2481_v44 }
 0x16d   : > { %v1035_v61 = vadd.f32 %v1019_v15, %v939_v45  ;;  %v547_v45 = vsel %vm531_vm15, 1.0, %v2513_v6 }
 0x16e   : > { %v3245_v62 = vpop.permute.xlu1 %690 }
 0x16f   : > { %vm719_vm2 = vcmp.eq.s32.totalorder %v2965_v5, %v3245_v62 }
 0x170   : > { %2427 = vset.pattern.permute.xlu1 %v3783_v8 }
 0x171   : > { %705 = vperm.xlu1 %2427, %v3254_v49  }
 0x173   : > { %v1063_v27 = vpop.permute.xlu1 %1062 }
 0x174   : > { %vm1099_vm1 = vcmp.eq.s32.totalorder %v2965_v5, %v1063_v27 }
 0x175   : > { %v1115_v25 = vsel %vm1099_vm1, 1.0, %v2513_v6  ;;  %2428 = vset.pattern.permute.xlu1 %v3787_v41 }
 0x176   : > { %v1131_v46 = vadd.f32 %v1115_v25, %v1035_v61  ;;  %891 = vperm.xlu1 %2428, %v3261_v24   ;;  %v735_v61 = vsel %vm719_vm2, 1.0, %v2513_v6 }
 0x178   : > { %2185 = vmatmul.mubr.f32.gmra.mrb[4].mxu0 %v1131_v46  ;;  %v3264_v53 = vpop.permute.xlu1 %597 }
 0x17a   : > { %2429 = vset.pattern.permute.xlu1 %v3783_v8 }
 0x17b   : > { %708 = vperm.xlu1 %2429, %v2684_v21  }
 0x17d   : > { %v970_v58 = vpop.permute.xlu1 %969 }
 0x17e   : > { %vm1004_vm9 = vcmp.eq.s32.totalorder %v2965_v5, %v970_v58  ;;  %v2477_v58 = vld [vmem:[%s2570_s30 + $0x8] sm:$0xff] }
 0x17f   : > { %2430 = vset.pattern.permute.xlu1 %v3787_v41  ;;  %v1020_v55 = vsel %vm1004_vm9, 1.0, %v2513_v6  ;;  %v341_v1 = vcvt.s32.f32 %v2477_v58 }
 0x180   : > { %894 = vperm.xlu1 %2430, %v3270_v59  }
 0x182   : > { %v3273_v34 = vpop.permute.xlu1 %600 }
 0x184   : > { %2431 = vset.pattern.permute.xlu1 %v3788_v11  ;;  %v636_v11 = vsel %vm620_vm4, 1.0, %v2513_v6 }
 0x185   : > { %801 = vperm.xlu1 %2431, %v3254_v49   ;;  %v652_v16 = vadd.f32 %v636_v11, %v556_v10  ;;  %v2478_v11 = vld [vmem:[%s2570_s30 + $0x48] sm:$0xff] }
 0x186   : > { %v349_v4 = vcvt.s32.f32 %v2478_v11 }
 0x187   : > { %v973_v8 = vpop.permute.xlu1 %972 }
 0x188   : > { %vm1005_vm8 = vcmp.eq.s32.totalorder %v2965_v5, %v973_v8  ;;  %v365_v17 = vmax.f32 %v349_v4, 1.0 }
 0x189   : > { %804 = vperm.xlu1 %2431, %v2684_v21   ;;  %v732_v21 = vsel %vm716_vm5, 1.0, %v2513_v6  ;;  %v1021_v54 = vsel %vm1005_vm8, 1.0, %v2513_v6  ;;  %vm1007_vm5 = vcmp.eq.s32.totalorder %v2965_v5, %v3800_v12 }
 0x18a   : > { %v748_v56 = vadd.f32 %v732_v21, %v652_v16  ;;  %v1037_v13 = vadd.f32 %v1021_v54, %v3184_v22  ;;  %v543_v22 = vsel %vm527_vm12, 1.0, %v2513_v6  ;;  %v1023_v10 = vsel %vm1007_vm5, 1.0, %v2513_v6  ;;  %1350 = vperm.xlu0 %2439, %v365_v17  }
 0x18b   : > { %v559_v19 = vadd.f32 %v543_v22, %v447_v43  ;;  %v357_v16 = vmax.f32 %v341_v1, 1.0  ;;  %vm529_vm5 = vcmp.eq.s32.totalorder %v2965_v5, %v3235_v37 }
 0x18c   : > { %v3289_v9 = vpop.permute.xlu1 %507  ;;  %v844_v14 = vadd.f32 %v828_v40, %v748_v56  ;;  %v1133_v31 = vadd.f32 %v1117_v28, %v1037_v13  ;;  %v2480_v28 = vld [vmem:[%s2570_s30 + $0x20] sm:$0xff] }
 0x18d   : > { %2433 = vset.pattern.permute.xlu1 %v3792_v57  ;;  %vm530_vm6 = vcmp.eq.s32.totalorder %v2965_v5, %v3289_v9  ;;  %v2479_v9 = vld [vmem:[%s2570_s30 + $0x10] sm:$0xff] }
 0x18e   : > { %990 = vperm.xlu1 %2433, %v3270_v59   ;;  %v940_v63 = vadd.f32 %v924_v33, %v844_v14  ;;  %v546_v40 = vsel %vm530_vm6, 1.0, %v2513_v6  ;;  %v450_v33 = vsel %vm434_vm7, 1.0, %v2513_v6  ;;  %v3802_v14 = vmov 8  }
 0x18f   : > { %v562_v13 = vadd.f32 %v546_v40, %v450_v33  ;;  %vm625_vm6 = vcmp.eq.s32.totalorder %v2965_v5, %v3273_v34  ;;  %vm528_vm7 = vcmp.eq.s32.totalorder %v2965_v5, %v3195_v39 }
 0x190   : > { %v1036_v47 = vadd.f32 %v1020_v55, %v940_v63  ;;  %v3372_v63 = vld [vmem:[%s2861_s10 + $0x70] sm:$0xff]  ;;  %v641_v37 = vsel %vm625_vm6, 1.0, %v2513_v6  ;;  %v544_v34 = vsel %vm528_vm7, 1.0, %v2513_v6  ;;  %vm1010_vm7 = vcmp.eq.s32.totalorder %v2965_v5, %v2997_v36 }
 0x191   : > { %v3301_v38 = vpop.permute.xlu1 %693  ;;  %2231 = vmatprep.mubr.msk.f32.mxu1 %vm1415_vm0, %v3372_v63 }
 0x192   : > { %2435 = vset.pattern.permute.xlu1 %v3785_v2  ;;  %2232 = vmatmul.mubr.msk.f32.gmra.mrb[12].mxu1 %vm1415_vm0, %v3379_v52 }
 0x193   : > { %1083 = vperm.xlu1 %2435, %v3261_v24  }
 0x196   : > { %v1066_v30 = vpop.permute.xlu1 %1065 }
 0x197   : > { %vm1100_vm13 = vcmp.eq.s32.totalorder %v2965_v5, %v1066_v30  ;;  %2436 = vset.pattern.permute.xlu1 %v3787_v41  ;;  %v3798_v41 = vld [vmem:[#allocation12_spill] sm:$0xff] }
 0x198   : > { %v1116_v3 = vsel %vm1100_vm13, 1.0, %v2513_v6  ;;  %900 = vperm.xlu1 %2436, %v3321_v20   ;;  %vm623_vm1 = vcmp.eq.s32.totalorder %v2965_v5, %v3798_v41  ;;  %v2482_v41 = vld [vmem:[%s2570_s30 + $0x58] sm:$0xff]  ;;  %vm628_vm13 = vcmp.eq.s32.totalorder %v2965_v5, %v3805_v29 }
 0x199   : > { %v1132_v18 = vadd.f32 %v1116_v3, %v1036_v47  ;;  %v3335_v51 = vpop.f32.mrb[0].mxu1  ;;  %v639_v15 = vsel %vm623_vm1, 1.0, %v2513_v6  ;;  %v344_v47 = vcvt.s32.f32 %v2480_v28 }
 0x19a   : > { %v655_v25 = vadd.f32 %v639_v15, %v559_v19  ;;  %v3803_v15 = vld [vmem:[#allocation9_spill] sm:$0xff]  ;;  %v3399_v12 = vpop.f32.mrb[1].mxu1 }
 0x19b   : > { %2187 = vmatprep.mubr.f32.mxu0 %v1132_v18  ;;  %v415_v32 = vpop.permute.xlu1 %414  ;;  %v360_v18 = vmax.f32 %v344_v47, 1.0  ;;  %vm723_vm10 = vcmp.eq.s32.totalorder %v2965_v5, %v3803_v15 }
 0x19c   : > { %vm435_vm3 = vcmp.eq.s32.totalorder %v2965_v5, %v415_v32  ;;  %2437 = vset.pattern.permute.xlu1 %v3792_v57  ;;  %2188 = vmatmul.mubr.f32.gmra.mrb[6].mxu0 %v1133_v31  ;;  %v3799_v57 = vld [vmem:[#allocation2_spill] sm:$0xff]  ;;  %v751_v46 = vadd.f32 %v735_v61, %v655_v25  ;;  %v351_v31 = vcvt.s32.f32 %v2482_v41 }
 0x19d   : > { %v451_v60 = vsel %vm435_vm3, 1.0, %v2513_v6  ;;  %993 = vperm.xlu1 %2437, %v3254_v49   ;;  %2190 = vmatprep.mubr.f32.mxu0 %v1134_v7  ;;  %vm815_vm4 = vcmp.eq.s32.totalorder %v2965_v5, %v3799_v57  ;;  %v362_v7 = vmax.f32 %v346_v26, 1.0  ;;  %v2483_v32 = vld [vmem:[%s2570_s30 + $0x40] sm:$0xff]  ;;  %v350_v57 = vcvt.s32.f32 %v2846_v35 }
 0x19e   : > { %v563_v27 = vadd.f32 %v547_v45, %v451_v60  ;;  %v831_v8 = vsel %vm815_vm4, 1.0, %v2513_v6  ;;  %v367_v43 = vmax.f32 %v351_v31, 1.0  ;;  %v348_v19 = vcvt.s32.f32 %v2483_v32 }
 0x19f   : > { %v847_v0 = vadd.f32 %v831_v8, %v751_v46  ;;  %v739_v46 = vsel %vm723_vm10, 1.0, %v2513_v6  ;;  %v366_v8 = vmax.f32 %v350_v57, 1.0  ;;  %vm624_vm10 = vcmp.eq.s32.totalorder %v2965_v5, %v3264_v53 }
 0x1a0   : > { %v3346_v62 = vpop.permute.xlu1 %696  ;;  %1360 = vperm.xlu0 %2439, %v367_v43   ;;  %v364_v25 = vmax.f32 %v348_v19, 1.0  ;;  %v640_v53 = vsel %vm624_vm10, 1.0, %v2513_v6  ;;  %vm916_vm10 = vcmp.eq.s32.totalorder %v2965_v5, %v3090_v42 }
 0x1a1   : > { %996 = vperm.xlu1 %2437, %v3321_v20  }
 0x1a5   : > { %2438 = vset.pattern.permute.xlu1 %v3785_v2  ;;  %v883_v48 = vpop.permute.xlu1 %882  ;;  %v342_v2 = vcvt.s32.f32 %v2479_v9 }
 0x1a6   : > { %vm911_vm8 = vcmp.eq.s32.totalorder %v2965_v5, %v883_v48  ;;  %1092 = vperm.xlu1 %2438, %v3321_v20   ;;  %v3804_v48 = vld [vmem:[#allocation7_spill] sm:$0xff] }
 0x1a7   : > { %v927_v21 = vsel %vm911_vm8, 1.0, %v2513_v6  ;;  %v358_v30 = vmax.f32 %v342_v2, 1.0  ;;  %vm532_vm12 = vcmp.eq.s32.totalorder %v2965_v5, %v3804_v48  ;;  %vm432_vm8 = vcmp.eq.s32.totalorder %v2965_v5, %v3182_v50 }
 0x1a8   : > { %v943_v56 = vadd.f32 %v927_v21, %v847_v0  ;;  %v548_v35 = vsel %vm532_vm12, 1.0, %v2513_v6  ;;  %v644_v0 = vsel %vm628_vm13, 1.0, %v2513_v6  ;;  %v448_v43 = vsel %vm432_vm8, 1.0, %v2513_v6 }
 0x1a9   : > { %vm720_vm12 = vcmp.eq.s32.totalorder %v2965_v5, %v3301_v38  ;;  %v560_v19 = vadd.f32 %v544_v34, %v448_v43 }
 0x1aa   : > { %2440 = vset.pattern.permute.xlu1 %v3802_v14  ;;  %v604_v54 = vpop.permute.xlu1 %603  ;;  %v3369_v55 = vadd.f32 %v1023_v10, %v943_v56  ;;  %v3806_v14 = vld [vmem:[#allocation14_spill] sm:$0xff]  ;;  %v736_v15 = vsel %vm720_vm12, 1.0, %v2513_v6 }
 0x1ab   : > { %vm626_vm9 = vcmp.eq.s32.totalorder %v2965_v5, %v604_v54  ;;  %1310 = vperm.xlu1 %2440, %v357_v16   ;;  %vm629_vm2 = vcmp.eq.s32.totalorder %v2965_v5, %v3806_v14  ;;  %v353_v54 = vcvt.s32.f32 %v3270_v59  ;;  %v545_v59 = vsel %vm529_vm5, 1.0, %v2513_v6 }
 0x1ac   : > { %v642_v3 = vsel %vm626_vm9, 1.0, %v2513_v6  ;;  %v645_v44 = vsel %vm629_vm2, 1.0, %v2513_v6  ;;  %vm721_vm9 = vcmp.eq.s32.totalorder %v2965_v5, %v3346_v62  ;;  %v1078_v62 = vpop.permute.xlu0 %1077 }
 0x1ad   : > { %v658_v23 = vadd.f32 %v642_v3, %v562_v13  ;;  %v352_v13 = vcvt.s32.f32 %v3261_v24  ;;  %v369_v3 = vmax.f32 %v353_v54, 1.0  ;;  %v737_v50 = vsel %vm721_vm9, 1.0, %v2513_v6 }
 0x1af   : > { %1315 = vperm.xlu1 %2440, %v358_v30   ;;  %v3384_v22 = vpop.permute.xlu1 %789  ;;  %1370 = vperm.xlu0 %2439, %v369_v3  }
 0x1b0   : > { %v1081_v48 = vpop.permute.xlu0 %1080 }
 0x1b3   : > { %1325 = vperm.xlu1 %2440, %v360_v18   ;;  %v3807_v18 = vld [vmem:[#allocation4_spill] sm:$0xff] }
 0x1b4   : > { %v607_v45 = vpop.permute.xlu1 %606  ;;  %vm433_vm4 = vcmp.eq.s32.totalorder %v2965_v5, %v3807_v18 }
 0x1b5   : > { %vm627_vm11 = vcmp.eq.s32.totalorder %v2965_v5, %v607_v45  ;;  %v449_v24 = vsel %vm433_vm4, 1.0, %v2513_v6  ;;  %vm1105_vm4 = vcmp.eq.s32.totalorder %v2965_v5, %v1081_v48 }
 0x1b6   : > { %v643_v60 = vsel %vm627_vm11, 1.0, %v2513_v6  ;;  %v561_v31 = vadd.f32 %v545_v59, %v449_v24  ;;  %v1026_v59 = vsel %vm1010_vm7, 1.0, %v2513_v6 }
 0x1b7   : > { %v659_v61 = vadd.f32 %v643_v60, %v563_v27  ;;  %1335 = vperm.xlu1 %2440, %v362_v7  }
 0x1b8   : > { %v657_v7 = vadd.f32 %v641_v37, %v561_v31  ;;  %v1087_v37 = vpop.permute.xlu0 %1086 }
 0x1b9   : > { %v3395_v58 = vpop.permute.xlu1 %792  ;;  %v3397_v1 = vadd.f32 %v739_v46, %v659_v61  ;;  %v656_v61 = vadd.f32 %v640_v53, %v560_v19 }
 0x1ba   : > { %vm817_vm11 = vcmp.eq.s32.totalorder %v2965_v5, %v3395_v58  ;;  %v753_v60 = vadd.f32 %v737_v50, %v657_v7 }
 0x1bb   : > { %1345 = vperm.xlu1 %2440, %v364_v25   ;;  %v833_v45 = vsel %vm817_vm11, 1.0, %v2513_v6 }
 0x1bc   : > { %v849_v58 = vadd.f32 %v833_v45, %v753_v60  ;;  %v1090_v43 = vpop.permute.xlu0 %1089 }
 0x1be   : > { %v418_v27 = vpop.permute.xlu1 %417 }
 0x1bf   : > { %vm436_vm14 = vcmp.eq.s32.totalorder %v2965_v5, %v418_v27  ;;  %1355 = vperm.xlu1 %2440, %v366_v8   ;;  %v752_v8 = vadd.f32 %v736_v15, %v656_v61 }
 0x1c0   : > { %v452_v11 = vsel %vm436_vm14, 1.0, %v2513_v6 }
 0x1c1   : > { %v564_v4 = vadd.f32 %v548_v35, %v452_v11 }
 0x1c2   : > { %v3415_v56 = vpop.f32.mrb[2].mxu1 }
 0x1c3   : > { %v700_v10 = vpop.permute.xlu1 %699  ;;  %v3409_v21 = vadd.f32 %v644_v0, %v564_v4  ;;  %v3417_v17 = vpop.f32.mrb[3].mxu1 }
 0x1c4   : > { %vm722_vm15 = vcmp.eq.s32.totalorder %v2965_v5, %v700_v10 }
 0x1c5   : > { %v738_v16 = vsel %vm722_vm15, 1.0, %v2513_v6  ;;  %vm816_vm15 = vcmp.eq.s32.totalorder %v2965_v5, %v3384_v22  ;;  %v3808_v22 = vld [vmem:[#allocation19_spill] sm:$0xff] }
 0x1c6   : > { %v3413_v9 = vadd.f32 %v738_v16, %v658_v23  ;;  %v368_v23 = vmax.f32 %v352_v13, 1.0  ;;  %v832_v46 = vsel %vm816_vm15, 1.0, %v2513_v6  ;;  %vm1009_vm2 = vcmp.eq.s32.totalorder %v2965_v5, %v3808_v22 }
 0x1c7   : > { %v848_v27 = vadd.f32 %v832_v46, %v752_v8  ;;  %v1025_v0 = vsel %vm1009_vm2, 1.0, %v2513_v6  ;;  %v355_v13 = vcvt.s32.f32 %v3321_v20  ;;  %vm1107_vm15 = vcmp.eq.s32.totalorder %v2965_v5, %v1087_v37 }
 0x1c8   : > { %v886_v2 = vpop.permute.xlu1 %885  ;;  %1365 = vperm.xlu1 %2440, %v368_v23   ;;  %v1123_v22 = vsel %vm1107_vm15, 1.0, %v2513_v6 }
 0x1c9   : > { %v371_v3 = vmax.f32 %v355_v13, 1.0 }
 0x1cb   : > { %1380 = vperm.xlu0 %2439, %v371_v3  }
 0x1cd   : > { %v421_v40 = vpop.permute.xlu1 %420 }
 0x1ce   : > { %vm437_vm1 = vcmp.eq.s32.totalorder %v2965_v5, %v421_v40 }
 0x1cf   : > { %v453_v30 = vsel %vm437_vm1, 1.0, %v2513_v6  ;;  %vm912_vm1 = vcmp.eq.s32.totalorder %v2965_v5, %v886_v2  ;;  %v1121_v2 = vsel %vm1105_vm4, 1.0, %v2513_v6  ;;  %vm1108_vm4 = vcmp.eq.s32.totalorder %v2965_v5, %v1090_v43 }
 0x1d2   : > { %v517_v33 = vpop.permute.xlu1 %516 }
 0x1d3   : > { %vm533_vm3 = vcmp.eq.s32.totalorder %v2965_v5, %v517_v33 }
 0x1d4   : > { %v549_v28 = vsel %vm533_vm3, 1.0, %v2513_v6  ;;  %vm1104_vm3 = vcmp.eq.s32.totalorder %v2965_v5, %v1078_v62 }
 0x1d5   : > { %v565_v47 = vadd.f32 %v549_v28, %v453_v30  ;;  %v1120_v4 = vsel %vm1104_vm3, 1.0, %v2513_v6  ;;  %v354_v28 = vcvt.s32.f32 %v3254_v49 }
 0x1d7   : > { %v889_v26 = vpop.permute.xlu1 %888  ;;  %v3432_v41 = vadd.f32 %v645_v44, %v565_v47  ;;  %v370_v18 = vmax.f32 %v354_v28, 1.0 }
 0x1d8   : > { %vm913_vm14 = vcmp.eq.s32.totalorder %v2965_v5, %v889_v26 }
 0x1d9   : > { %v929_v25 = vsel %vm913_vm14, 1.0, %v2513_v6  ;;  %1375 = vperm.xlu1 %2440, %v370_v18  }
 0x1da   : > { %v945_v29 = vadd.f32 %v929_v25, %v849_v58 }
 0x1dc   : > { %v1075_v39 = vpop.permute.xlu1 %1074  ;;  %v1041_v10 = vadd.f32 %v1025_v0, %v945_v29 }
 0x1dd   : > { %vm1103_vm13 = vcmp.eq.s32.totalorder %v2965_v5, %v1075_v39 }
 0x1de   : > { %v1119_v32 = vsel %vm1103_vm13, 1.0, %v2513_v6  ;;  %v1137_v54 = vadd.f32 %v1121_v2, %v1041_v10 }
 0x1df   : > { %v1135_v38 = vadd.f32 %v1119_v32, %v3369_v55  ;;  %v928_v55 = vsel %vm912_vm1, 1.0, %v2513_v6  ;;  %v932_v32 = vsel %vm916_vm10, 1.0, %v2513_v6  ;;  %vm1938_vm10 = vcmask 7168  }
 0x1e0   : > { %v944_v11 = vadd.f32 %v928_v55, %v848_v27 }
 0x1e1   : > { %2191 = vmatmul.mubr.f32.gmra.mrb[8].mxu0 %v1135_v38  ;;  %v796_v57 = vpop.permute.xlu1 %795 }
 0x1e2   : > { %vm818_vm6 = vcmp.eq.s32.totalorder %v2965_v5, %v796_v57 }
 0x1e3   : > { %v834_v44 = vsel %vm818_vm6, 1.0, %v2513_v6 }
 0x1e4   : > { %v850_v20 = vadd.f32 %v834_v44, %v3413_v9  ;;  %v3496_v9 = vpop.permute.xlu0 %1305 }
 0x1e6   : > { %v982_v35 = vpop.permute.xlu1 %981 }
 0x1e7   : > { %vm1008_vm5 = vcmp.eq.s32.totalorder %v2965_v5, %v982_v35 }
 0x1e8   : > { %v1024_v16 = vsel %vm1008_vm5, 1.0, %v2513_v6  ;;  %v1321_v42 = vpop.permute.xlu0 %1320 }
 0x1e9   : > { %v1040_v40 = vadd.f32 %v1024_v16, %v944_v11  ;;  %2441 = vrcp.f32 %v1321_v42 }
 0x1eb   : > { %v799_v33 = vpop.permute.xlu1 %798  ;;  %v1136_v14 = vadd.f32 %v1120_v4, %v1040_v40 }
 0x1ec   : > { %v3479_v47 = vpop.f32.mrb[4].mxu1  ;;  %vm819_vm12 = vcmp.eq.s32.totalorder %v2965_v5, %v799_v33  ;;  %v1331_v43 = vpop.permute.xlu0 %1330 }
 0x1ed   : > { %2193 = vmatprep.mubr.f32.mxu0 %v1136_v14  ;;  %v3481_v23 = vpop.f32.mrb[5].mxu1 }
 0x1ee   : > { %2194 = vmatmul.mubr.f32.gmra.mrb[10].mxu0 %v1137_v54 }
 0x1f0   : > { %v706_v30 = vpop.permute.xlu1 %705 }
 0x1f1   : > { %vm724_vm9 = vcmp.eq.s32.totalorder %v2965_v5, %v706_v30 }
 0x1f2   : > { %v740_v50 = vsel %vm724_vm9, 1.0, %v2513_v6  ;;  %vm1889_vm9 = vcmask 130048  }
 0x1f3   : > { %v756_v36 = vadd.f32 %v740_v50, %v3409_v21  ;;  %v835_v21 = vsel %vm819_vm12, 1.0, %v2513_v6  ;;  %v2442_v27 = vpop.eup %2441 }
 0x1f4   : > { %v851_v25 = vadd.f32 %v835_v21, %v3397_v1 }
 0x1f5   : > { %v892_v26 = vpop.permute.xlu1 %891 }
 0x1f6   : > { %vm914_vm8 = vcmp.eq.s32.totalorder %v2965_v5, %v892_v26 }
 0x1f7   : > { %v930_v49 = vsel %vm914_vm8, 1.0, %v2513_v6 }
 0x1f8   : > { %v946_v24 = vadd.f32 %v930_v49, %v850_v20  ;;  %v3534_v49 = vld [vmem:[%s2861_s10] sm:$0xff] }
 0x1fa   : > { %v709_v34 = vpop.permute.xlu1 %708  ;;  %v1042_v31 = vadd.f32 %v1026_v59, %v946_v24  ;;  %v3541_v59 = vld [vmem:[%s2861_s10 + $0x8] sm:$0xff] }
 0x1fb   : > { %vm725_vm2 = vcmp.eq.s32.totalorder %v2965_v5, %v709_v34 }
 0x1fc   : > { %v741_v16 = vsel %vm725_vm2, 1.0, %v2513_v6 }
 0x1fd   : > { %v757_v14 = vadd.f32 %v741_v16, %v3432_v41 }
 0x1ff   : > { %v895_v39 = vpop.permute.xlu1 %894 }
 0x200   : > { %vm915_vm13 = vcmp.eq.s32.totalorder %v2965_v5, %v895_v39 }
 0x201   : > { %v931_v60 = vsel %vm915_vm13, 1.0, %v2513_v6 }
 0x202   : > { %v947_v46 = vadd.f32 %v931_v60, %v851_v25  ;;  %v1341_v60 = vpop.permute.xlu0 %1340 }
 0x204   : > { %v802_v62 = vpop.permute.xlu1 %801 }
 0x205   : > { %vm820_vm11 = vcmp.eq.s32.totalorder %v2965_v5, %v802_v62 }
 0x206   : > { %v836_v53 = vsel %vm820_vm11, 1.0, %v2513_v6 }
 0x207   : > { %v852_v7 = vadd.f32 %v836_v53, %v756_v36 }
 0x208   : > { %v805_v19 = vpop.permute.xlu1 %804 }
 0x209   : > { %v948_v45 = vadd.f32 %v932_v32, %v852_v7  ;;  %vm821_vm3 = vcmp.eq.s32.totalorder %v2965_v5, %v805_v19 }
 0x20a   : > { %v3502_v38 = vpop.f32.mrb[0].mxu0  ;;  %v837_v40 = vsel %vm821_vm3, 1.0, %v2513_v6 }
 0x20b   : > { %v3505_v15 = vpop.f32.mrb[1].mxu0  ;;  %v853_v28 = vadd.f32 %v837_v40, %v757_v14  ;;  %v1654_v40 = vld [vmem:[%s3742_s5 + $0x30] sm:$0xff] }
 0x20d   : > { %v991_v61 = vpop.permute.xlu1 %990 }
 0x20e   : > { %vm1011_vm14 = vcmp.eq.s32.totalorder %v2965_v5, %v991_v61  ;;  %v3545_v34 = vpop.f32.mrb[6].mxu1 }
 0x20f   : > { %v1027_v57 = vsel %vm1011_vm14, 1.0, %v2513_v6 }
 0x210   : > { %v1043_v58 = vadd.f32 %v1027_v57, %v947_v46 }
 0x212   : > { %v1084_v8 = vpop.permute.xlu1 %1083  ;;  %v1139_v29 = vadd.f32 %v1123_v22, %v1043_v58 }
 0x213   : > { %vm1106_vm1 = vcmp.eq.s32.totalorder %v2965_v5, %v1084_v8 }
 0x214   : > { %v1122_v48 = vsel %vm1106_vm1, 1.0, %v2513_v6 }
 0x215   : > { %v1138_v55 = vadd.f32 %v1122_v48, %v1042_v31 }
 0x217   : > { %2196 = vmatprep.mubr.f32.mxu0 %v1138_v55  ;;  %v901_v1 = vpop.permute.xlu1 %900 }
 0x218   : > { %2197 = vmatmul.mubr.f32.gmra.mrb[12].mxu0 %v1139_v29  ;;  %vm917_vm6 = vcmp.eq.s32.totalorder %v2965_v5, %v901_v1  ;;  %v1649_v29 = vld [vmem:[%s3742_s5 + $0x8] sm:$0xff] }
 0x219   : > { %v2183_v35 = vpop.f32.mrb[2].mxu0  ;;  %v933_v13 = vsel %vm917_vm6, 1.0, %v2513_v6 }
 0x21a   : > { %v1390_v0 = vmul.f32 %v2442_v27, %v2183_v35  ;;  %v1234_v11 = vpop.f32.mrb[3].mxu0  ;;  %v949_v18 = vadd.f32 %v933_v13, %v853_v28  ;;  %v1650_v35 = vld [vmem:[%s3742_s5 + $0x10] sm:$0xff] }
 0x21c   : > { %v3518_v4 = vadd.f32 %v3335_v51, %v1390_v0  ;;  %v994_v10 = vpop.permute.xlu1 %993  ;;  %v1124_v51 = vsel %vm1108_vm4, 1.0, %v2513_v6 }
 0x21d   : > { %vm1012_vm5 = vcmp.eq.s32.totalorder %v2965_v5, %v994_v10  ;;  %v1653_v10 = vld [vmem:[%s3742_s5 + $0x28] sm:$0xff] }
 0x21e   : > { %v1028_v2 = vsel %vm1012_vm5, 1.0, %v2513_v6 }
 0x21f   : > { %v1044_v33 = vadd.f32 %v1028_v2, %v948_v45 }
 0x220   : > { %v997_v54 = vpop.permute.xlu1 %996 }
 0x221   : > { %vm1013_vm7 = vcmp.eq.s32.totalorder %v2965_v5, %v997_v54  ;;  %v1140_v30 = vadd.f32 %v1124_v51, %v1044_v33  ;;  %v1655_v33 = vld [vmem:[%s3742_s5 + $0x38] sm:$0xff]  ;;  %v1351_v51 = vpop.permute.xlu0 %1350 }
 0x222   : > { %v1029_v3 = vsel %vm1013_vm7, 1.0, %v2513_v6  ;;  %v2326_v14 = vpack.c.bf16 %v1655_v33, %v1654_v40 }
 0x223   : > { %2199 = vmatprep.mubr.f32.mxu0 %v1140_v30  ;;  %v1045_v26 = vadd.f32 %v1029_v3, %v949_v18 }
 0x225   : > { %v1093_v44 = vpop.permute.xlu1 %1092  ;;  %v1361_v30 = vpop.permute.xlu0 %1360 }
 0x226   : > { %vm1109_vm8 = vcmp.eq.s32.totalorder %v2965_v5, %v1093_v44  ;;  %v3547_v5 = vpop.f32.mrb[7].mxu1 }
 0x227   : > { %v1125_v41 = vsel %vm1109_vm8, 1.0, %v2513_v6  ;;  %v3552_v62 = vpop.f32.mrb[8].mxu1 }
 0x228   : > { %v1141_v20 = vadd.f32 %v1125_v41, %v1045_v26  ;;  %v3554_v36 = vpop.f32.mrb[9].mxu1 }
 0x22a   : > { %2200 = vmatmul.mubr.f32.gmra.mrb[14].mxu0 %v1141_v20  ;;  %v3536_v24 = vpop.permute.xlu1 %1310 }
 0x22b   : > { %2210 = vmatprep.mubr.msk.f32.mxu0 %vm1415_vm0, %v3534_v49 }
 0x22e   : > { %v1316_v37 = vpop.permute.xlu1 %1315  ;;  %2211 = vmatmul.mubr.msk.f32.vlgmr.msra.gmra.mrb[16].mxu0 %vm1415_vm0, %v3541_v59  ;;  %vm1663_vm0 = vcmask 523264  }
 0x22f   : > { %2443 = vrcp.f32 %v1316_v37 }
 0x230   : > { %2445 = vrcp.f32 %v1331_v43 }
 0x232   : > { %v1326_v50 = vpop.permute.xlu1 %1325 }
 0x233   : > { %2447 = vrcp.f32 %v1326_v50 }
 0x234   : > { %2449 = vrcp.f32 %v1341_v60 }
 0x236   : > { %v1336_v61 = vpop.permute.xlu1 %1335 }
 0x237   : > { %2451 = vrcp.f32 %v1336_v61 }
 0x238   : > { %2453 = vrcp.f32 %v1351_v51 }
 0x239   : > { %v2444_v6 = vpop.eup %2443 }
 0x23a   : > { %v1388_v31 = vmul.f32 %v2444_v6, %v1234_v11  ;;  %v2446_v53 = vpop.eup %2445  ;;  %v1652_v11 = vld [vmem:[%s3742_s5 + $0x20] sm:$0xff]  ;;  %v1346_v54 = vpop.permute.xlu1 %1345 }
 0x23b   : > { %v3562_v57 = vpop.f32.mrb[10].mxu1  ;;  %2455 = vrcp.f32 %v1346_v54 }
 0x23c   : > { %v3550_v39 = vadd.f32 %v3399_v12, %v1388_v31  ;;  %v3564_v58 = vpop.f32.mrb[11].mxu1  ;;  %2457 = vrcp.f32 %v1361_v30 }
 0x23d   : > { %v2448_v7 = vpop.eup %2447 }
 0x23e   : > { %v2450_v25 = vpop.eup %2449  ;;  %v1356_v3 = vpop.permute.xlu1 %1355 }
 0x23f   : > { %2459 = vrcp.f32 %v1356_v3 }
 0x241   : > { %v2452_v46 = vpop.eup %2451 }
 0x242   : > { %v2454_v13 = vpop.eup %2453 }
 0x245   : > { %v2456_v28 = vpop.eup %2455 }
 0x246   : > { %v2458_v6 = vpop.eup %2457 }
 0x249   : > { %v2460_v31 = vpop.eup %2459 }
 0x24b   : > { %v2186_v32 = vpop.f32.mrb[4].mxu0 }
 0x24c   : > { %v1394_v19 = vmul.f32 %v2446_v53, %v2186_v32  ;;  %v1244_v45 = vpop.f32.mrb[5].mxu0 }
 0x24d   : > { %v1392_v42 = vmul.f32 %v2448_v7, %v1244_v45  ;;  %v1371_v45 = vpop.permute.xlu0 %1370 }
 0x24e   : > { %v3557_v21 = vadd.f32 %v3415_v56, %v1394_v19  ;;  %2461 = vrcp.f32 %v1371_v45 }
 0x24f   : > { %v3560_v12 = vadd.f32 %v3417_v17, %v1392_v42  ;;  %v1648_v17 = vld [vmem:[%s3742_s5] sm:$0xff]  ;;  %v1366_v42 = vpop.permute.xlu1 %1365 }
 0x250   : > { %v2314_v1 = vpack.c.bf16 %v1649_v29, %v1648_v17  ;;  %2463 = vrcp.f32 %v1366_v42  ;;  %v3646_v42 = vld [vmem:[%s3743_s6] ss:$0 sm:$0xff] }
 0x252   : > { %2315 = vmatprep.subr.bf16.mxu1 %v2314_v1 }
 0x253   : > { %2317 = vmatpush3.bf16.msra.mxu1 %v2314_v1 }
 0x265   : > { %v2233_v16 = vpop.f32.mrb[12].mxu1 }
 0x266   : > { %v1600_v2 = vpop.f32.mrb[13].mxu1 }
 0x26f   : > { %v2189_v8 = vpop.f32.mrb[6].mxu0 }
 0x270   : > { %v1398_v48 = vmul.f32 %v2450_v25, %v2189_v8  ;;  %v1254_v22 = vpop.f32.mrb[7].mxu0 }
 0x271   : > { %v1396_v55 = vmul.f32 %v2452_v46, %v1254_v22 }
 0x272   : > { %v3567_v56 = vadd.f32 %v3479_v47, %v1398_v48  ;;  %v1651_v47 = vld [vmem:[%s3742_s5 + $0x18] sm:$0xff]  ;;  %v1381_v48 = vpop.permute.xlu0 %1380 }
 0x273   : > { %v3576_v27 = vadd.f32 %v3481_v23, %v1396_v55  ;;  %v2318_v0 = vpack.c.bf16 %v1651_v47, %v1650_v35  ;;  %v2322_v23 = vpack.c.bf16 %v1653_v10, %v1652_v11  ;;  %2465 = vrcp.f32 %v1381_v48 }
 0x275   : > { %2319 = vmatprep.subr.bf16.mxu1 %v2318_v0 }
 0x276   : > { %2321 = vmatpush3.bf16.msra.mxu1 %v2318_v0 }
 0x277   : > { %2323 = vmatprep.subr.bf16.mxu1 %v2322_v23 }
 0x27a   : > { %2325 = vmatpush3.bf16.msra.mxu1 %v2322_v23 }
 0x27b   : > { %2327 = vmatprep.subr.bf16.mxu1 %v2326_v14 }
 0x27e   : > { %2329 = vmatpush3.bf16.msra.mxu1 %v2326_v14 }
 0x2b4   : > { %v2192_v18 = vpop.f32.mrb[8].mxu0 }
 0x2b5   : > { %v1402_v44 = vmul.f32 %v2454_v13, %v2192_v18  ;;  %v1264_v26 = vpop.f32.mrb[9].mxu0 }
 0x2b6   : > { %v1400_v41 = vmul.f32 %v2456_v28, %v1264_v26 }
 0x2b7   : > { %v3597_v20 = vadd.f32 %v3545_v34, %v1402_v44  ;;  %v2462_v34 = vpop.eup %2461 }
 0x2b8   : > { %v3600_v37 = vadd.f32 %v3547_v5, %v1400_v41  ;;  %v2464_v60 = vpop.eup %2463 }
 0x2c1   : > { %v2195_v43 = vpop.f32.mrb[10].mxu0 }
 0x2c2   : > { %v1406_v50 = vmul.f32 %v2458_v6, %v2195_v43  ;;  %v1274_v53 = vpop.f32.mrb[11].mxu0 }
 0x2c3   : > { %v1404_v7 = vmul.f32 %v2460_v31, %v1274_v53 }
 0x2c4   : > { %v3603_v32 = vadd.f32 %v3552_v62, %v1406_v50  ;;  %v1376_v62 = vpop.permute.xlu1 %1375 }
 0x2c5   : > { %v3606_v19 = vadd.f32 %v3554_v36, %v1404_v7  ;;  %2467 = vrcp.f32 %v1376_v62  ;;  %v2466_v36 = vpop.eup %2465 }
 0x2c6   : > { %2469 = vrcp.f32 %v3536_v24 }
 0x2c7   : > { %2471 = vrcp.f32 %v3496_v9  ;;  %v2050_v9 = vld [vmem:[%s3741_s4] ss:$0 sm:$0xff] }
 0x2c8   : > { %v1618_v51 = vadd.f32 %v2050_v9, %v3550_v39  ;;  %v1621_v28 = vadd.f32 %v2050_v9, %v3557_v21  ;;  %v1622_v39 = vadd.f32 %v2050_v9, %v3576_v27  ;;  %v1623_v18 = vadd.f32 %v2050_v9, %v3567_v56 }
 0x2c9   : > { %v1624_v44 = vadd.f32 %v2050_v9, %v3600_v37  ;;  %v1625_v21 = vadd.f32 %v2050_v9, %v3597_v20  ;;  %v1626_v27 = vadd.f32 %v2050_v9, %v3606_v19  ;;  %v1627_v56 = vadd.f32 %v2050_v9, %v3603_v32 }
 0x2ca   : > { %v1634_v30 = vmax.f32 %v1618_v51, 0.0  ;;  %v1639_v26 = vmax.f32 %v1623_v18, 0.0 }
 0x2cb   : > { %v1640_v41 = vmax.f32 %v1624_v44, 0.0  ;;  %v1641_v6 = vmax.f32 %v1625_v21, 0.0  ;;  %v1642_v31 = vmax.f32 %v1626_v27, 0.0  ;;  %v1643_v37 = vmax.f32 %v1627_v56, 0.0 }
 0x2cf   : > { %v2468_v55 = vpop.eup %2467 }
 0x2d0   : > { %v2470_v17 = vpop.eup %2469 }
 0x2d1   : > { %v2472_v1 = vpop.eup %2471 }
 0x2eb   : > { %v2198_v5 = vpop.f32.mrb[12].mxu0 }
 0x2ec   : > { %v1410_v61 = vmul.f32 %v2462_v34, %v2198_v5  ;;  %v1284_v25 = vpop.f32.mrb[13].mxu0 }
 0x2ed   : > { %v1408_v46 = vmul.f32 %v2464_v60, %v1284_v25 }
 0x2ee   : > { %v1596_v8 = vadd.f32 %v3562_v57, %v1410_v61  ;;  %v1386_v57 = vmul.f32 %v2470_v17, %v3502_v38 }
 0x2ef   : > { %v1591_v22 = vadd.f32 %v3564_v58, %v1408_v46  ;;  %v1384_v58 = vmul.f32 %v2472_v1, %v3505_v15  ;;  %v1620_v15 = vadd.f32 %v2050_v9, %v3560_v12  ;;  %v1638_v12 = vmax.f32 %v1622_v39, 0.0 }
 0x2f0   : > { %v1629_v50 = vadd.f32 %v2050_v9, %v1596_v8 }
 0x2f1   : > { %v1636_v3 = vmax.f32 %v1620_v15, 0.0  ;;  %v1628_v43 = vadd.f32 %v2050_v9, %v1591_v22 }
 0x2f2   : > { %v1645_v7 = vmax.f32 %v1629_v50, 0.0 }
 0x2f3   : > { %v1644_v53 = vmax.f32 %v1628_v43, 0.0 }
 0x2fd   : > { %v2201_v29 = vpop.f32.mrb[14].mxu0 }
 0x2fe   : > { %v1414_v35 = vmul.f32 %v2466_v36, %v2201_v29  ;;  %v1294_v47 = vpop.f32.mrb[15].mxu0 }
 0x2ff   : > { %v1412_v0 = vmul.f32 %v2468_v55, %v1294_v47 }
 0x300   : > { %v1606_v11 = vadd.f32 %v2233_v16, %v1414_v35  ;;  %v1619_v16 = vadd.f32 %v2050_v9, %v3518_v4  ;;  %v1637_v4 = vmax.f32 %v1621_v28, 0.0 }
 0x301   : > { %v1601_v10 = vadd.f32 %v1600_v2, %v1412_v0  ;;  %v2212_v23 = vpop.f32.mrb[16].mxu0  ;;  %v2484_v0 = vld [vmem:[%s2861_s10 + $0x18] sm:$0xff] }
 0x302   : > { %v1536_v40 = vadd.f32 %v2212_v23, %v1386_v57  ;;  %v1530_v33 = vpop.f32.mrb[17].mxu0  ;;  %v1635_v2 = vmax.f32 %v1619_v16, 0.0  ;;  %v1631_v19 = vadd.f32 %v2050_v9, %v1606_v11  ;;  %v2487_v16 = vld [vmem:[%s2861_s10 + $0x20] sm:$0xff] }
 0x303   : > { %v1531_v24 = vadd.f32 %v1530_v33, %v1384_v58  ;;  %v1630_v20 = vadd.f32 %v2050_v9, %v1601_v10  ;;  %v2485_v58 = vld [vmem:[%s2861_s10 + $0x10] sm:$0xff] }
 0x304   : > { %v1617_v14 = vadd.f32 %v2050_v9, %v1536_v40  ;;  %v1647_v32 = vmax.f32 %v1631_v19, 0.0 }
 0x305   : > { %v1616_v54 = vadd.f32 %v2050_v9, %v1531_v24  ;;  %v1646_v45 = vmax.f32 %v1630_v20, 0.0 }
 0x306   : > { %v1633_v38 = vmax.f32 %v1617_v14, 0.0  ;;  %v2486_v14 = vld [vmem:[%s2861_s10 + $0x28] sm:$0xff] }
 0x307   : > { %v1632_v13 = vmax.f32 %v1616_v54, 0.0 }
 0x309   : > { %2250 = vmatprep.mubr.msk.f32.mxu1 %vm1663_vm0, %v1632_v13 }
 0x30a   : > { %2251 = vmatmul.mubr.msk.f32.vlgmr.msra.gmra.mrb[14].mxu1 %vm1663_vm0, %v1633_v38 }
 0x30b   : > { %2253 = vmatprep.mubr.msk.f32.mxu1 %vm1663_vm0, %v1634_v30 }
 0x30e   : > { %2254 = vmatmul.mubr.msk.f32.gmra.mrb[16].mxu1 %vm1663_vm0, %v1635_v2 }
 0x30f   : > { %2256 = vmatprep.mubr.msk.f32.mxu1 %vm1663_vm0, %v1636_v3 }
 0x312   : > { %2257 = vmatmul.mubr.msk.f32.gmra.mrb[18].mxu1 %vm1663_vm0, %v1637_v4  ;;  %v2488_v4 = vld [vmem:[%s2861_s10 + $0x38] sm:$0xff] }
 0x313   : > { %2259 = vmatprep.mubr.msk.f32.mxu1 %vm1663_vm0, %v1638_v12 }
 0x316   : > { %2260 = vmatmul.mubr.msk.f32.gmra.mrb[20].mxu1 %vm1663_vm0, %v1639_v26  ;;  %v2489_v26 = vld [vmem:[%s2861_s10 + $0x30] sm:$0xff] }
 0x317   : > { %2262 = vmatprep.mubr.msk.f32.mxu1 %vm1663_vm0, %v1640_v41 }
 0x31a   : > { %2263 = vmatmul.mubr.msk.f32.gmra.mrb[22].mxu1 %vm1663_vm0, %v1641_v6 }
 0x31b   : > { %2265 = vmatprep.mubr.msk.f32.mxu1 %vm1663_vm0, %v1642_v31 }
 0x31e   : > { %2266 = vmatmul.mubr.msk.f32.gmra.mrb[24].mxu1 %vm1663_vm0, %v1643_v37  ;;  %v2490_v37 = vld [vmem:[%s2861_s10 + $0x48] sm:$0xff] }
 0x31f   : > { %2268 = vmatprep.mubr.msk.f32.mxu1 %vm1663_vm0, %v1644_v53 }
 0x322   : > { %2269 = vmatmul.mubr.msk.f32.gmra.mrb[26].mxu1 %vm1663_vm0, %v1645_v7  ;;  %v2491_v7 = vld [vmem:[%s2861_s10 + $0x40] sm:$0xff] }
 0x323   : > { %2271 = vmatprep.mubr.msk.f32.mxu1 %vm1663_vm0, %v1646_v45 }
 0x326   : > { %2272 = vmatmul.mubr.msk.f32.gmra.mrb[28].mxu1 %vm1663_vm0, %v1647_v32 }
 0x3dd   : > { %v2252_v34 = vpop.f32.mrb[14].mxu1 }
 0x3de   : > { %v1784_v60 = vadd.f32 %v2252_v34, %v3646_v42  ;;  %v1778_v5 = vpop.f32.mrb[15].mxu1 }
 0x3df   : > { %v1779_v61 = vadd.f32 %v3646_v42, %v1778_v5 }
 0x3e0   : > { %v1858_v25 = vmax.f32 %v1784_v60, 0.0 }
 0x3e1   : > { %v1857_v46 = vmax.f32 %v1779_v61, 0.0  ;;  %v2255_v8 = vpop.f32.mrb[16].mxu1 }
 0x3e2   : > { %v1874_v48 = vmul.f32 %v1858_v25, %v3541_v59  ;;  %v1794_v22 = vadd.f32 %v2255_v8, %v3646_v42  ;;  %v1788_v62 = vpop.f32.mrb[17].mxu1  ;;  %v2492_v25 = vld [vmem:[%s2861_s10 + $0x58] sm:$0xff] }
 0x3e3   : > { %v1873_v36 = vmul.f32 %v1857_v46, %v3534_v49  ;;  %v1789_v55 = vadd.f32 %v3646_v42, %v1788_v62 }
 0x3e4   : > { %v1860_v17 = vmax.f32 %v1794_v22, 0.0  ;;  %v1893_v29 = vsel %vm1889_vm9, %v1874_v48, 0.0  ;;  %v2493_v22 = vld [vmem:[%s2861_s10 + $0x50] sm:$0xff] }
 0x3e5   : > { %v1859_v1 = vmax.f32 %v1789_v55, 0.0  ;;  %1894 = vadd.xlane.f32.xlu0 %v1893_v29  ;;  %v2258_v35 = vpop.f32.mrb[18].mxu1  ;;  %v1890_v47 = vsel %vm1889_vm9, %v1873_v36, 0.0 }
 0x3e6   : > { %v1876_v11 = vmul.f32 %v2484_v0, %v1860_v17  ;;  %v1804_v59 = vadd.f32 %v2258_v35, %v3646_v42  ;;  %v1798_v57 = vpop.f32.mrb[19].mxu1  ;;  %1891 = vadd.xlane.f32.xlu1 %v1890_v47  ;;  %v2494_v47 = vld [vmem:[%s2861_s10 + $0x68] sm:$0xff] }
 0x3e7   : > { %v1875_v49 = vmul.f32 %v2485_v58, %v1859_v1  ;;  %v1799_v10 = vadd.f32 %v3646_v42, %v1798_v57  ;;  %v2495_v57 = vld [vmem:[%s2861_s10 + $0x60] sm:$0xff] }
 0x3e8   : > { %v1862_v23 = vmax.f32 %v1804_v59, 0.0  ;;  %v1899_v40 = vsel %vm1889_vm9, %v1876_v11, 0.0 }
 0x3e9   : > { %v1861_v33 = vmax.f32 %v1799_v10, 0.0  ;;  %v2261_v9 = vpop.f32.mrb[20].mxu1  ;;  %v1896_v24 = vsel %vm1889_vm9, %v1875_v49, 0.0 }
 0x3ea   : > { %v1878_v51 = vmul.f32 %v2486_v14, %v1862_v23  ;;  %v1814_v54 = vadd.f32 %v2261_v9, %v3646_v42  ;;  %v1808_v13 = vpop.f32.mrb[21].mxu1  ;;  %1897 = vadd.xlane.f32.xlu0 %v1896_v24  ;;  %1900 = vadd.xlane.f32.xlu1 %v1899_v40 }
 0x3eb   : > { %v1877_v38 = vmul.f32 %v2487_v16, %v1861_v33  ;;  %v1809_v30 = vadd.f32 %v3646_v42, %v1808_v13 }
 0x3ec   : > { %v1864_v15 = vmax.f32 %v1814_v54, 0.0  ;;  %v1905_v2 = vsel %vm1889_vm9, %v1878_v51, 0.0 }
 0x3ed   : > { %v1863_v28 = vmax.f32 %v1809_v30, 0.0  ;;  %v2264_v3 = vpop.f32.mrb[22].mxu1  ;;  %v1902_v39 = vsel %vm1889_vm9, %v1877_v38, 0.0 }
 0x3ee   : > { %v1880_v18 = vmul.f32 %v2488_v4, %v1864_v15  ;;  %v1824_v12 = vadd.f32 %v2264_v3, %v3646_v42  ;;  %v1818_v44 = vpop.f32.mrb[23].mxu1  ;;  %1903 = vadd.xlane.f32.xlu0 %v1902_v39  ;;  %1906 = vadd.xlane.f32.xlu1 %v1905_v2 }
 0x3ef   : > { %v1879_v21 = vmul.f32 %v2489_v26, %v1863_v28  ;;  %v1819_v41 = vadd.f32 %v3646_v42, %v1818_v44 }
 0x3f0   : > { %v1866_v27 = vmax.f32 %v1824_v12, 0.0  ;;  %v1911_v6 = vsel %vm1889_vm9, %v1880_v18, 0.0 }
 0x3f1   : > { %v1865_v56 = vmax.f32 %v1819_v41, 0.0  ;;  %v2267_v31 = vpop.f32.mrb[24].mxu1  ;;  %v1908_v43 = vsel %vm1889_vm9, %v1879_v21, 0.0 }
 0x3f2   : > { %v1882_v50 = vmul.f32 %v2490_v37, %v1866_v27  ;;  %v1834_v53 = vadd.f32 %v2267_v31, %v3646_v42  ;;  %v1828_v20 = vpop.f32.mrb[25].mxu1  ;;  %1909 = vadd.xlane.f32.xlu0 %v1908_v43  ;;  %1912 = vadd.xlane.f32.xlu1 %v1911_v6 }
 0x3f3   : > { %v1881_v19 = vmul.f32 %v2491_v7, %v1865_v56  ;;  %v1829_v45 = vadd.f32 %v3646_v42, %v1828_v20 }
 0x3f4   : > { %v1868_v32 = vmax.f32 %v1834_v53, 0.0  ;;  %v1917_v34 = vsel %vm1889_vm9, %v1882_v50, 0.0 }
 0x3f5   : > { %v1867_v60 = vmax.f32 %v1829_v45, 0.0  ;;  %v2270_v5 = vpop.f32.mrb[26].mxu1  ;;  %v1914_v61 = vsel %vm1889_vm9, %v1881_v19, 0.0 }
 0x3f6   : > { %v1884_v46 = vmul.f32 %v2492_v25, %v1868_v32  ;;  %v1844_v8 = vadd.f32 %v2270_v5, %v3646_v42  ;;  %v1838_v48 = vpop.f32.mrb[27].mxu1  ;;  %1915 = vadd.xlane.f32.xlu0 %v1914_v61  ;;  %1918 = vadd.xlane.f32.xlu1 %v1917_v34 }
 0x3f7   : > { %v1883_v62 = vmul.f32 %v2493_v22, %v1867_v60  ;;  %v1839_v36 = vadd.f32 %v3646_v42, %v1838_v48 }
 0x3f8   : > { %v1870_v55 = vmax.f32 %v1844_v8, 0.0  ;;  %v1923_v17 = vsel %vm1889_vm9, %v1884_v46, 0.0 }
 0x3f9   : > { %v1869_v29 = vmax.f32 %v1839_v36, 0.0  ;;  %v2273_v1 = vpop.f32.mrb[28].mxu1  ;;  %v1920_v35 = vsel %vm1889_vm9, %v1883_v62, 0.0 }
 0x3fa   : > { %v1886_v0 = vmul.f32 %v2494_v47, %v1870_v55  ;;  %v1854_v11 = vadd.f32 %v2273_v1, %v3646_v42  ;;  %v1848_v59 = vpop.f32.mrb[29].mxu1  ;;  %1921 = vadd.xlane.f32.xlu0 %v1920_v35  ;;  %1924 = vadd.xlane.f32.xlu1 %v1923_v17 }
 0x3fb   : > { %v1885_v58 = vmul.f32 %v2495_v57, %v1869_v29  ;;  %v1849_v49 = vadd.f32 %v3646_v42, %v1848_v59 }
 0x3fc   : > { %v1872_v10 = vmax.f32 %v1854_v11, 0.0  ;;  %v1929_v23 = vsel %vm1889_vm9, %v1886_v0, 0.0 }
 0x3fd   : > { %v1871_v40 = vmax.f32 %v1849_v49, 0.0  ;;  %v1926_v33 = vsel %vm1889_vm9, %v1885_v58, 0.0 }
 0x3fe   : > { %v1888_v9 = vmul.f32 %v1872_v10, %v3379_v52  ;;  %1927 = vadd.xlane.f32.xlu0 %v1926_v33  ;;  %1930 = vadd.xlane.f32.xlu1 %v1929_v23 }
 0x3ff   : > { %v1887_v24 = vmul.f32 %v1871_v40, %v3372_v63 }
 0x400   : > { %v1935_v14 = vsel %vm1889_vm9, %v1888_v9, 0.0 }
 0x401   : > { %v1932_v51 = vsel %vm1889_vm9, %v1887_v24, 0.0 }
 0x402   : > { %1933 = vadd.xlane.f32.xlu0 %v1932_v51  ;;  %1936 = vadd.xlane.f32.xlu1 %v1935_v14 }
 0x472   : > { %v1895_v63 = vpop.xlane.xlu0 %1894 }
 0x473   : > { %1940 = vst.msk [vmem:[%s3700_s11 + $0x8] sm:$0xff] %vm1938_vm10, %v1895_v63  ;;  %v1892_v52 = vpop.xlane.xlu1 %1891 }
 0x474   : > { %1939 = vst.msk [vmem:[%s3700_s11] sm:$0xff] %vm1938_vm10, %v1892_v52 }
 0x477   : > { %v1898_v42 = vpop.xlane.xlu0 %1897  ;;  %v1901_v54 = vpop.xlane.xlu1 %1900 }
 0x478   : > { %1941 = vst.msk [vmem:[%s3700_s11 + $0x10] sm:$0xff] %vm1938_vm10, %v1898_v42  ;;  %1942 = vst.msk [vmem:[%s3700_s11 + $0x18] sm:$0xff] %vm1938_vm10, %v1901_v54 }
 0x47b   : > { %v1904_v13 = vpop.xlane.xlu0 %1903  ;;  %v1907_v16 = vpop.xlane.xlu1 %1906 }
 0x47c   : > { %1943 = vst.msk [vmem:[%s3700_s11 + $0x20] sm:$0xff] %vm1938_vm10, %v1904_v13  ;;  %1944 = vst.msk [vmem:[%s3700_s11 + $0x28] sm:$0xff] %vm1938_vm10, %v1907_v16 }
 0x47f   : > { %v1910_v38 = vpop.xlane.xlu0 %1909  ;;  %v1913_v30 = vpop.xlane.xlu1 %1912 }
 0x480   : > { %1945 = vst.msk [vmem:[%s3700_s11 + $0x30] sm:$0xff] %vm1938_vm10, %v1910_v38  ;;  %1946 = vst.msk [vmem:[%s3700_s11 + $0x38] sm:$0xff] %vm1938_vm10, %v1913_v30 }
 0x483   : > { %v1916_v15 = vpop.xlane.xlu0 %1915  ;;  %v1919_v2 = vpop.xlane.xlu1 %1918 }
 0x484   : > { %1947 = vst.msk [vmem:[%s3700_s11 + $0x40] sm:$0xff] %vm1938_vm10, %v1916_v15  ;;  %1948 = vst.msk [vmem:[%s3700_s11 + $0x48] sm:$0xff] %vm1938_vm10, %v1919_v2 }
 0x487   : > { %v1922_v28 = vpop.xlane.xlu0 %1921  ;;  %v1925_v3 = vpop.xlane.xlu1 %1924 }
 0x488   : > { %1949 = vst.msk [vmem:[%s3700_s11 + $0x50] sm:$0xff] %vm1938_vm10, %v1922_v28  ;;  %1950 = vst.msk [vmem:[%s3700_s11 + $0x58] sm:$0xff] %vm1938_vm10, %v1925_v3 }
 0x48b   : > { %v1928_v39 = vpop.xlane.xlu0 %1927  ;;  %v1931_v4 = vpop.xlane.xlu1 %1930 }
 0x48c   : > { %1951 = vst.msk [vmem:[%s3700_s11 + $0x60] sm:$0xff] %vm1938_vm10, %v1928_v39  ;;  %1952 = vst.msk [vmem:[%s3700_s11 + $0x68] sm:$0xff] %vm1938_vm10, %v1931_v4 }
 0x48f   : > { %v1934_v18 = vpop.xlane.xlu0 %1933  ;;  %v1937_v12 = vpop.xlane.xlu1 %1936 }
 0x490   : > { %1953 = vst.msk [vmem:[%s3700_s11 + $0x70] sm:$0xff] %vm1938_vm10, %v1934_v18  ;;  %1954 = vst.msk [vmem:[%s3700_s11 + $0x78] sm:$0xff] %vm1938_vm10, %v1937_v12 }
 0x491 PF: > { %s17_s24 = sadd.s32 1, %s2502_s24  }
 0x492   : > { %p14_p4 = scmp.ge.s32.totalorder %s17_s24, 4  }
 0x494   :  { %16 = sbr.rel (!%p14_p4) target bundleno = 1 (0x1), region = 81 }

</bundles_post_ra>
